<compile_context>
chip_gen: v5e
topology: v5e:2x2
jax: 0.10.0
libtpu: 0.0.40
codegen_flags: <defaults>
</compile_context>

<pallas_src>
import functools

import jax
import jax.numpy as jnp
from jax.experimental import pallas as pl
from jax.experimental.pallas import tpu as pltpu


def _round_up(x, m):
    return ((x + m - 1) // m) * m


def _pick_row_tile(M, C):
    # Larger row tiles amortize per-grid-step overhead; cap bytes so the (tm, C) f32 tile
    # stays modest even on v7x's smaller VMEM.
    if M % 256 == 0 and C <= 2048:
        return 256
    return 128


def _pick_tk(Kp):
    # Largest multiple-of-128 divisor of Kp that is <= 2048 (keeps tiles well under VMEM).
    for t in range(2048, 0, -128):
        if Kp % t == 0:
            return t
    return 128


# ----------------------------- Pallas kernels -----------------------------

def _matmul_bias_kernel(a_ref, b_ref, bias_ref, o_ref, acc_ref, *, act):
    @pl.when(pl.program_id(2) == 0)
    def _():
        acc_ref[...] = jnp.broadcast_to(bias_ref[...], acc_ref.shape)

    acc_ref[...] += jnp.dot(a_ref[...], b_ref[...],
                            preferred_element_type=jnp.float32)

    @pl.when(pl.program_id(2) == pl.num_programs(2) - 1)
    def _():
        y = acc_ref[...]
        if act == "sigmoid":
            y = jax.nn.sigmoid(y)
        o_ref[...] = y.astype(o_ref.dtype)


def _matmul_bias_stats_kernel(a_ref, b_ref, bias_ref, o_ref, s_ref, q_ref,
                              acc_ref, accs_ref, accq_ref, *, act):
    # grid order is (j, i, k): j = output-column block (outermost), i = row block,
    # k = reduction block.  Stats for a column block accumulate over all row blocks.
    i = pl.program_id(1)
    k = pl.program_id(2)
    ni = pl.num_programs(1)
    nk = pl.num_programs(2)

    @pl.when(k == 0)
    def _():
        acc_ref[...] = jnp.broadcast_to(bias_ref[...], acc_ref.shape)

    @pl.when(jnp.logical_and(i == 0, k == 0))
    def _():
        accs_ref[...] = jnp.zeros_like(accs_ref)
        accq_ref[...] = jnp.zeros_like(accq_ref)

    acc_ref[...] += jnp.dot(a_ref[...], b_ref[...],
                            preferred_element_type=jnp.float32)

    @pl.when(k == nk - 1)
    def _():
        y = acc_ref[...]
        if act == "sigmoid":
            y = jax.nn.sigmoid(y)
        o_ref[...] = y.astype(o_ref.dtype)
        accs_ref[...] += jnp.sum(y, axis=0, keepdims=True)
        accq_ref[...] += jnp.sum(y * y, axis=0, keepdims=True)

    @pl.when(jnp.logical_and(i == ni - 1, k == nk - 1))
    def _():
        s_ref[...] = accs_ref[...]
        q_ref[...] = accq_ref[...]


def matmul_bias(a, bp, biasp, n_out, act="none", want_stats=False):
    """a: (M, K) float; bp: (Kp, Np) bf16 pre-packed RHS; biasp: (Np,) f32.

    Returns out (M, n_out) f32, and if want_stats also per-column (sum, sum_sq)."""
    M, K = a.shape
    Kp, Np = bp.shape
    a = a.astype(jnp.bfloat16)
    tm = 256 if M % 256 == 0 else 128
    Mp = _round_up(M, tm)
    if (Mp, Kp) != (M, K):
        a = jnp.pad(a, ((0, Mp - M), (0, Kp - K)))
    nim = Mp // tm
    if nim == 1:
        tn = 256 if Np % 256 == 0 else 128   # keep >=2 parallel blocks for dual-core chips
    else:
        tn = 512 if Np % 512 == 0 else (256 if Np % 256 == 0 else 128)
    tk = _pick_tk(Kp)
    bias2 = biasp.reshape(1, Np)

    if not want_stats:
        grid = (nim, Np // tn, Kp // tk)
        out = pl.pallas_call(
            functools.partial(_matmul_bias_kernel, act=act),
            out_shape=jax.ShapeDtypeStruct((Mp, Np), jnp.float32),
            grid_spec=pltpu.PrefetchScalarGridSpec(
                num_scalar_prefetch=0,
                grid=grid,
                in_specs=[pl.BlockSpec((tm, tk), lambda i, j, k: (i, k)),
                          pl.BlockSpec((tk, tn), lambda i, j, k: (k, j)),
                          pl.BlockSpec((1, tn), lambda i, j, k: (0, j))],
                out_specs=pl.BlockSpec((tm, tn), lambda i, j, k: (i, j)),
                scratch_shapes=[pltpu.VMEM((tm, tn), jnp.float32)]),
            compiler_params=pltpu.CompilerParams(
                dimension_semantics=("parallel", "parallel", "arbitrary")),
        )(a, bp, bias2)
        if (Mp, Np) != (M, n_out):
            out = out[:M, :n_out]
        return out

    grid = (Np // tn, nim, Kp // tk)
    out, s, q = pl.pallas_call(
        functools.partial(_matmul_bias_stats_kernel, act=act),
        out_shape=(jax.ShapeDtypeStruct((Mp, Np), jnp.float32),
                   jax.ShapeDtypeStruct((1, Np), jnp.float32),
                   jax.ShapeDtypeStruct((1, Np), jnp.float32)),
        grid_spec=pltpu.PrefetchScalarGridSpec(
            num_scalar_prefetch=0,
            grid=grid,
            in_specs=[pl.BlockSpec((tm, tk), lambda j, i, k: (i, k)),
                      pl.BlockSpec((tk, tn), lambda j, i, k: (k, j)),
                      pl.BlockSpec((1, tn), lambda j, i, k: (0, j))],
            out_specs=[pl.BlockSpec((tm, tn), lambda j, i, k: (i, j)),
                       pl.BlockSpec((1, tn), lambda j, i, k: (0, j)),
                       pl.BlockSpec((1, tn), lambda j, i, k: (0, j))],
            scratch_shapes=[pltpu.VMEM((tm, tn), jnp.float32),
                            pltpu.VMEM((1, tn), jnp.float32),
                            pltpu.VMEM((1, tn), jnp.float32)]),
        compiler_params=pltpu.CompilerParams(
            dimension_semantics=("parallel", "arbitrary", "arbitrary")),
    )(a, bp, bias2)
    if (Mp, Np) != (M, n_out):
        out = out[:M, :n_out]
    s = s[0, :n_out]
    q = q[0, :n_out]
    extra = Mp - M
    if extra:
        # padded rows of A are zero -> their conv output equals the bias; remove them.
        bv = biasp[:n_out]
        s = s - extra * bv
        q = q - extra * bv * bv
    return out, s, q


def _affine_kernel(x_ref, s_ref, t_ref, o_ref, *, act):
    y = x_ref[...] * s_ref[...] + t_ref[...]
    if act == "relu":
        y = jnp.maximum(y, 0.0)
    o_ref[...] = y


def _affine_res_kernel(x_ref, r_ref, s_ref, t_ref, o_ref):
    o_ref[...] = jnp.maximum(x_ref[...] * s_ref[...] + t_ref[...] + r_ref[...], 0.0)


def _fold_factor(M, C):
    # Fold narrow channel counts into full 128-wide lanes (per-channel scale/shift is
    # simply tiled) so the elementwise pass uses unmasked lane-dense stores.
    if C < 128 and 128 % C == 0 and M % (128 // C) == 0:
        return 128 // C
    return 1


def affine_act(x2, scale, shift, act="none"):
    M, C = x2.shape
    f = _fold_factor(M, C)
    if f > 1:
        x2 = x2.reshape(M // f, f * C)
        scale = jnp.tile(scale, f)
        shift = jnp.tile(shift, f)
    Mf, Cf = x2.shape
    tm = _pick_row_tile(Mf, Cf)
    Mp = _round_up(Mf, tm)
    if Mp != Mf:
        x2 = jnp.pad(x2, ((0, Mp - Mf), (0, 0)))
    out = pl.pallas_call(
        functools.partial(_affine_kernel, act=act),
        out_shape=jax.ShapeDtypeStruct((Mp, Cf), jnp.float32),
        grid_spec=pltpu.PrefetchScalarGridSpec(
            num_scalar_prefetch=0,
            grid=(Mp // tm,),
            in_specs=[pl.BlockSpec((tm, Cf), lambda i: (i, 0)),
                      pl.BlockSpec((1, Cf), lambda i: (0, 0)),
                      pl.BlockSpec((1, Cf), lambda i: (0, 0))],
            out_specs=pl.BlockSpec((tm, Cf), lambda i: (i, 0))),
        compiler_params=pltpu.CompilerParams(
            dimension_semantics=("parallel",)),
    )(x2, scale.reshape(1, Cf), shift.reshape(1, Cf))
    if Mp != Mf:
        out = out[:Mf]
    if f > 1:
        out = out.reshape(M, C)
    return out


def affine_add_relu(x2, r2, scale, shift):
    M, C = x2.shape
    f = _fold_factor(M, C)
    if f > 1:
        x2 = x2.reshape(M // f, f * C)
        r2 = r2.reshape(M // f, f * C)
        scale = jnp.tile(scale, f)
        shift = jnp.tile(shift, f)
    Mf, Cf = x2.shape
    tm = _pick_row_tile(Mf, Cf)
    Mp = _round_up(Mf, tm)
    if Mp != Mf:
        x2 = jnp.pad(x2, ((0, Mp - Mf), (0, 0)))
        r2 = jnp.pad(r2, ((0, Mp - Mf), (0, 0)))
    out = pl.pallas_call(
        _affine_res_kernel,
        out_shape=jax.ShapeDtypeStruct((Mp, Cf), jnp.float32),
        grid_spec=pltpu.PrefetchScalarGridSpec(
            num_scalar_prefetch=0,
            grid=(Mp // tm,),
            in_specs=[pl.BlockSpec((tm, Cf), lambda i: (i, 0)),
                      pl.BlockSpec((tm, Cf), lambda i: (i, 0)),
                      pl.BlockSpec((1, Cf), lambda i: (0, 0)),
                      pl.BlockSpec((1, Cf), lambda i: (0, 0))],
            out_specs=pl.BlockSpec((tm, Cf), lambda i: (i, 0))),
        compiler_params=pltpu.CompilerParams(
            dimension_semantics=("parallel",)),
    )(x2, r2, scale.reshape(1, Cf), shift.reshape(1, Cf))
    if Mp != Mf:
        out = out[:Mf]
    if f > 1:
        out = out.reshape(M, C)
    return out


# ----------------------------- NN building blocks -----------------------------

@functools.partial(jax.jit,
                   static_argnames=("w_shape", "stride", "padding", "dilation",
                                    "act", "stats"))
def _conv2d_nhwc(x, wp, biasp, *, w_shape, stride, padding, dilation, act, stats):
    """NHWC conv via bf16 im2col patches -> Pallas MXU matmul. x: (N,H,W,CI) f32."""
    CO, CI, KH, KW = w_shape
    N, H, W, _ = x.shape
    (pt, pb), (plf, prg) = padding
    Hp, Wp = H + pt + pb, W + plf + prg
    OH = (Hp - dilation * (KH - 1) - 1) // stride + 1
    OW = (Wp - dilation * (KW - 1) - 1) // stride + 1
    xb = jnp.pad(x, ((0, 0), (pt, pb), (plf, prg), (0, 0))).astype(jnp.bfloat16)
    if KH == 1 and KW == 1:
        a = xb[:, :(OH - 1) * stride + 1:stride,
                  :(OW - 1) * stride + 1:stride, :].reshape(N * OH * OW, CI)
    else:
        cols = []
        for i in range(KH):
            for j in range(KW):
                hi, wi = i * dilation, j * dilation
                cols.append(xb[:, hi:hi + (OH - 1) * stride + 1:stride,
                                  wi:wi + (OW - 1) * stride + 1:stride, :])
        # (N, OH, OW, KH*KW, CI) -> (M, KH*KW*CI); matches the (kh, kw, ci) weight packing
        a = jnp.stack(cols, axis=3).reshape(N * OH * OW, KH * KW * CI)
    if stats:
        out2d, s, q = matmul_bias(a, wp, biasp, CO, act=act, want_stats=True)
        return out2d.reshape(N, OH, OW, CO), s, q
    out2d = matmul_bias(a, wp, biasp, CO, act=act)
    return out2d.reshape(N, OH, OW, CO)


def conv2d(x, p, stride=1, padding=0, dilation=1, act="none", stats=False):
    if isinstance(padding, int):
        padding = ((padding, padding), (padding, padding))
    return _conv2d_nhwc(x, p["wp"], p["bp"], w_shape=p["shape"], stride=stride,
                        padding=padding, dilation=dilation, act=act, stats=stats)


@functools.partial(jax.jit, static_argnames=("relu",))
def _bn_from_stats(y, s, q, gamma, beta, *, relu):
    # Training-mode BatchNorm2d (fresh nn.Module default): batch statistics, biased var.
    # s/q are per-channel sum and sum-of-squares of y (zeros contribute nothing).
    N, H, W, C = y.shape
    cnt = N * H * W
    mean = s / cnt
    var = jnp.maximum(q / cnt - mean * mean, 0.0)
    scale = gamma * jax.lax.rsqrt(var + 1e-5)
    shift = beta - mean * scale
    out = affine_act(y.reshape(-1, C), scale, shift, act="relu" if relu else "none")
    return out.reshape(N, H, W, C)


@jax.jit
def _bn_add_relu_from_stats(y, s, q, res, gamma, beta):
    # bn3 + residual add + relu fused into a single elementwise pass.
    N, H, W, C = y.shape
    cnt = N * H * W
    mean = s / cnt
    var = jnp.maximum(q / cnt - mean * mean, 0.0)
    scale = gamma * jax.lax.rsqrt(var + 1e-5)
    shift = beta - mean * scale
    out = affine_add_relu(y.reshape(-1, C), res.reshape(-1, C), scale, shift)
    return out.reshape(N, H, W, C)


def conv_bn(x, cp, bnp, stride=1, padding=0, dilation=1, relu=False):
    """conv -> BatchNorm(batch stats) [-> ReLU]; BN stats come from the conv epilogue."""
    y, s, q = conv2d(x, cp, stride=stride, padding=padding, dilation=dilation, stats=True)
    return _bn_from_stats(y, s, q, bnp["gamma"], bnp["beta"], relu=relu)


@jax.jit
def _even_upsample2x(y):
    """Place y at the (even, even) positions of a 2x upsampled map (rest zero)."""
    N, H, W, C = y.shape
    z = jnp.zeros_like(y)
    row = jnp.stack([y, z], axis=3).reshape(N, H, 2 * W, C)
    return jnp.stack([row, jnp.zeros_like(row)], axis=2).reshape(N, 2 * H, 2 * W, C)


# Stride-phase decomposition of ConvTranspose2d(k=7, s=2, p=3, output_padding=1):
# output row 2u+r uses kernel taps _CT7_TAPS[r] (descending) over x[u-1 : u-1+T].
_CT7_TAPS = {0: (5, 3, 1), 1: (6, 4, 2, 0)}
_CT7_PADS = {0: (1, 1), 1: (1, 2)}


@jax.jit
def _interleave2x2(p00, p01, p10, p11):
    N, H, W, C = p00.shape
    r0 = jnp.stack([p00, p01], axis=3).reshape(N, H, 2 * W, C)
    r1 = jnp.stack([p10, p11], axis=3).reshape(N, H, 2 * W, C)
    return jnp.stack([r0, r1], axis=2).reshape(N, 2 * H, 2 * W, C)


@jax.jit
def maxpool3x3s2p1_with_indices(x):
    """nn.MaxPool2d(3, stride=2, padding=1, return_indices=True) on NHWC."""
    N, H, W, C = x.shape
    OH = (H + 2 - 3) // 2 + 1
    OW = (W + 2 - 3) // 2 + 1
    xp = jnp.pad(x, ((0, 0), (1, 1), (1, 1), (0, 0)), constant_values=-jnp.inf)
    vals, idxs = [], []
    for i in range(3):
        for j in range(3):
            v = xp[:, i:i + 2 * (OH - 1) + 1:2, j:j + 2 * (OW - 1) + 1:2, :]
            h = jnp.arange(OH) * 2 + i - 1
            w = jnp.arange(OW) * 2 + j - 1
            ind = h[:, None] * W + w[None, :]
            vals.append(v)
            idxs.append(jnp.broadcast_to(ind[None, :, :, None], v.shape))
    vals = jnp.stack(vals, axis=-1)
    idxs = jnp.stack(idxs, axis=-1)
    arg = jnp.argmax(vals, axis=-1)
    maxv = jnp.take_along_axis(vals, arg[..., None], axis=-1)[..., 0]
    ind = jnp.take_along_axis(idxs, arg[..., None], axis=-1)[..., 0]
    return maxv, ind


@jax.jit
def max_unpool2x2(x, ind):
    """nn.MaxUnpool2d(kernel_size=2, stride=2) on NHWC via one batched scatter."""
    N, H, W, C = x.shape
    OH, OW = 2 * H, 2 * W
    out = jnp.zeros((N, OH * OW, C), x.dtype)
    xf = x.reshape(N, H * W, C)
    indf = ind.reshape(N, H * W, C)
    n_idx = jnp.arange(N)[:, None, None]
    c_idx = jnp.arange(C)[None, None, :]
    out = out.at[n_idx, indf, c_idx].set(xf)
    return out.reshape(N, OH, OW, C)


# ----------------------------- parameter construction -----------------------------

class Init:
    def __init__(self, seed=0):
        self.key = jax.random.PRNGKey(seed)

    def normal(self, shape, std=0.01):
        self.key, k = jax.random.split(self.key)
        return std * jax.random.normal(k, shape, dtype=jnp.float32)


def pack_conv(w, b=None):
    """Pre-pack a (CO, CI, KH, KW) conv weight into a padded (Kp, Np) bf16 matmul RHS."""
    CO, CI, KH, KW = w.shape
    K = KH * KW * CI
    Kp, Np = _round_up(K, 128), _round_up(CO, 128)
    wm = jnp.transpose(w, (2, 3, 1, 0)).reshape(K, CO)      # (kh, kw, ci) ordering
    wp = jnp.zeros((Kp, Np), jnp.bfloat16).at[:K, :CO].set(wm.astype(jnp.bfloat16))
    bp = jnp.zeros((Np,), jnp.float32)
    if b is not None:
        bp = bp.at[:CO].set(b)
    return {"wp": wp, "bp": bp, "shape": (CO, CI, KH, KW)}


def conv_p(init, co, ci, kh, kw, bias=True):
    w = init.normal((co, ci, kh, kw))
    b = init.normal((co,)) if bias else None
    return pack_conv(w, b)


def bn_p(c):
    return {"gamma": jnp.ones((c,), jnp.float32), "beta": jnp.zeros((c,), jnp.float32)}


def convT1x1_p(init, ci, co):
    w_ct = init.normal((ci, co, 1, 1))
    return pack_conv(jnp.transpose(w_ct, (1, 0, 2, 3)))      # equivalent 1x1 conv weight


def convT7x7_p(init, ci, co):
    w_ct = init.normal((ci, co, 7, 7))
    phases = {}
    for r in (0, 1):
        for c in (0, 1):
            sub = jnp.take(w_ct, jnp.array(_CT7_TAPS[r]), axis=2)
            sub = jnp.take(sub, jnp.array(_CT7_TAPS[c]), axis=3)   # (CI, CO, Th, Tw)
            phases[f"p{r}{c}"] = pack_conv(jnp.transpose(sub, (1, 0, 2, 3)))
    return phases


def bottleneck_p(init, inplanes, planes, has_ds):
    p = {"conv1": conv_p(init, planes, inplanes, 1, 1, bias=False), "bn1": bn_p(planes),
         "conv2": conv_p(init, planes, planes, 3, 3, bias=False), "bn2": bn_p(planes),
         "conv3": conv_p(init, planes * 4, planes, 1, 1, bias=False), "bn3": bn_p(planes * 4)}
    if has_ds:
        p["ds_conv"] = conv_p(init, planes * 4, inplanes, 1, 1, bias=False)
        p["ds_bn"] = bn_p(planes * 4)
    return p


LAYER_CFG = {
    "layer1": dict(planes=64, blocks=3, stride=1, dilation=1),
    "layer2": dict(planes=128, blocks=4, stride=2, dilation=1),
    "layer3": dict(planes=256, blocks=6, stride=1, dilation=2),
    "layer4": dict(planes=512, blocks=3, stride=1, dilation=4),
}


def build_aspp_params(init, cin=2048, cout=1024):
    p = {"b0_conv": conv_p(init, cout, cin, 1, 1, bias=False), "b0_bn": bn_p(cout)}
    for k in range(3):
        p[f"b{k + 1}_conv"] = conv_p(init, cout, cin, 3, 3, bias=True)
        p[f"b{k + 1}_bn"] = bn_p(cout)
    p["img_conv"] = conv_p(init, cout, cin, 1, 1, bias=False)
    p["img_bn"] = bn_p(cout)
    p["conv1x1"] = conv_p(init, cout, cout * 5, 1, 1, bias=False)
    p["bn1x1"] = bn_p(cout)
    return p


def build_encoder_params(init):
    p = {}
    w3 = init.normal((64, 3, 7, 7))
    # mimic the Encoder.__init__ trick: 4-channel conv1 whose 4th input channel is zero
    w4 = jnp.zeros((64, 4, 7, 7), jnp.float32).at[:, :3].set(w3)
    p["conv1"] = pack_conv(w4)
    p["bn1"] = bn_p(64)
    inplanes = 64
    for name in ("layer1", "layer2", "layer3", "layer4"):
        cfg = LAYER_CFG[name]
        planes, blocks, stride, dil = cfg["planes"], cfg["blocks"], cfg["stride"], cfg["dilation"]
        has_ds = (stride != 1) or (inplanes != planes * 4) or (dil in (2, 4))
        blks = [bottleneck_p(init, inplanes, planes, has_ds)]
        inplanes = planes * 4
        for _ in range(1, blocks):
            blks.append(bottleneck_p(init, inplanes, planes, False))
        p[name] = blks
    p["aspp"] = build_aspp_params(init, 2048, 1024)
    return p


def build_decoder_params(init):
    p = {}
    p["u1_conv1"] = conv_p(init, 1024, 1024, 3, 3); p["u1_bn1"] = bn_p(1024)
    p["u1_ct"] = convT1x1_p(init, 1024, 1024);      p["u1_bn2"] = bn_p(1024)
    p["u1_conv2"] = conv_p(init, 1024, 1024, 3, 3); p["u1_bn3"] = bn_p(1024)
    for i, (ci, co) in enumerate([(1280, 1024), (1024, 512), (512, 256), (256, 64)]):
        p[f"u2_conv{i}"] = conv_p(init, co, ci, 3, 3); p[f"u2_bn{i}"] = bn_p(co)
    p["conv1x1_2"] = conv_p(init, 16, 64, 1, 1, bias=True)
    p["u3_conv1"] = conv_p(init, 64, 80, 3, 3); p["u3_bn1"] = bn_p(64)
    p["u3_ct"] = convT7x7_p(init, 64, 64);      p["u3_bn2"] = bn_p(64)
    p["u3_conv2"] = conv_p(init, 64, 64, 3, 3); p["u3_bn3"] = bn_p(64)
    p["u4_conv1"] = conv_p(init, 64, 67, 3, 3); p["u4_bn1"] = bn_p(64)
    p["u4_conv2"] = conv_p(init, 64, 64, 3, 3); p["u4_bn2"] = bn_p(64)
    p["u4_conv3"] = conv_p(init, 1, 64, 3, 3)
    return p


# ----------------------------- forward passes (NHWC) -----------------------------

def bottleneck_fwd(p, x, stride, dilation):
    out = conv_bn(x, p["conv1"], p["bn1"], stride=stride, relu=True)
    out = conv_bn(out, p["conv2"], p["bn2"], padding=dilation, dilation=dilation, relu=True)
    y, s, q = conv2d(out, p["conv3"], stats=True)
    if "ds_conv" in p:
        residual = conv_bn(x, p["ds_conv"], p["ds_bn"], stride=stride, relu=False)
    else:
        residual = x
    return _bn_add_relu_from_stats(y, s, q, residual,
                                   p["bn3"]["gamma"], p["bn3"]["beta"])


def aspp_fwd(p, x):
    outs = [conv_bn(x, p["b0_conv"], p["b0_bn"])]
    for k, d in enumerate([6, 12, 18]):
        outs.append(conv_bn(x, p[f"b{k + 1}_conv"], p[f"b{k + 1}_bn"], padding=d, dilation=d))
    pooled = jnp.mean(x, axis=(1, 2), keepdims=True)        # AdaptiveAvgPool2d(1)
    img = conv_bn(pooled, p["img_conv"], p["img_bn"])
    # bilinear upsample of a 1x1 map == constant broadcast
    img = jnp.broadcast_to(img, (x.shape[0], x.shape[1], x.shape[2], img.shape[-1]))
    out = jnp.concatenate(outs + [img], axis=-1)
    return conv_bn(out, p["conv1x1"], p["bn1x1"])


def encoder_fwd(p, x):
    skip1 = x[..., :3]
    skip2 = conv_bn(x, p["conv1"], p["bn1"], stride=2, padding=3, relu=True)
    y, ind = maxpool3x3s2p1_with_indices(skip2)

    def run_layer(name, y):
        cfg = LAYER_CFG[name]
        for bi, bp in enumerate(p[name]):
            s = cfg["stride"] if bi == 0 else 1
            y = bottleneck_fwd(bp, y, s, cfg["dilation"])
        return y

    skip3 = run_layer("layer1", y)
    y = run_layer("layer2", skip3)
    y = run_layer("layer3", y)
    y = run_layer("layer4", y)
    y = aspp_fwd(p["aspp"], y)
    return y, ind, skip1, skip2, skip3


def decoder_fwd(p, x, ind, skip1, skip2, skip3):
    # upsample1
    y = conv_bn(x, p["u1_conv1"], p["u1_bn1"], padding=1, relu=True)
    # ConvTranspose2d(k=1, s=2, output_padding=1, bias=False) == matmul + even scatter.
    # BN stats reuse the matmul-epilogue stats (inserted zeros add nothing to sum/sum-sq);
    # the BN count comes from the upsampled tensor's shape.
    yc, s, q = conv2d(x=y, p=p["u1_ct"], stats=True)
    y = _even_upsample2x(yc)
    y = _bn_from_stats(y, s, q, p["u1_bn2"]["gamma"], p["u1_bn2"]["beta"], relu=True)
    y = conv_bn(y, p["u1_conv2"], p["u1_bn3"], padding=1, relu=True)
    y = jnp.concatenate([y, skip3], axis=-1)
    # upsample2
    for i in range(4):
        y = conv_bn(y, p[f"u2_conv{i}"], p[f"u2_bn{i}"], padding=1, relu=True)
    y = max_unpool2x2(y, ind)
    skip = conv2d(skip2, p["conv1x1_2"])
    y = jnp.concatenate([y, skip], axis=-1)
    # upsample3
    y = conv_bn(y, p["u3_conv1"], p["u3_bn1"], padding=1, relu=True)
    # ConvTranspose2d(k=7, s=2, p=3, op=1) via 4 stride-phase convs; BN stats are the sum
    # of the four phases' matmul-epilogue stats.
    ys = {}
    s = q = jnp.zeros((64,), jnp.float32)
    for r in (0, 1):
        for c in (0, 1):
            yp, sp, qp = conv2d(y, p["u3_ct"][f"p{r}{c}"], stride=1,
                                padding=(_CT7_PADS[r], _CT7_PADS[c]), stats=True)
            ys[(r, c)] = yp
            s = s + sp
            q = q + qp
    y = _interleave2x2(ys[(0, 0)], ys[(0, 1)], ys[(1, 0)], ys[(1, 1)])
    y = _bn_from_stats(y, s, q, p["u3_bn2"]["gamma"], p["u3_bn2"]["beta"], relu=True)
    y = conv_bn(y, p["u3_conv2"], p["u3_bn3"], padding=1, relu=True)
    y = jnp.concatenate([y, skip1], axis=-1)
    # upsample4 (final sigmoid fused into the last conv's matmul epilogue)
    y = conv_bn(y, p["u4_conv1"], p["u4_bn1"], padding=1, relu=True)
    y = conv_bn(y, p["u4_conv2"], p["u4_bn2"], padding=1, relu=True)
    return conv2d(y, p["u4_conv3"], padding=1, act="sigmoid")


def resnet_forward(enc_p, dec_p, x_nchw):
    x = jnp.transpose(x_nchw, (0, 2, 3, 1))    # NCHW -> NHWC once at the module boundary
    feat, ind, skip1, skip2, skip3 = encoder_fwd(enc_p, x)
    out = decoder_fwd(dec_p, feat, ind, skip1, skip2, skip3)
    return jnp.transpose(out, (0, 3, 1, 2))    # back to NCHW at the module boundary


# ----------------------------- main -----------------------------

if __name__ == "__main__":
    init = Init(seed=0)
    enc_params = build_encoder_params(init)
    dec_params = build_decoder_params(init)

    # Smallest spatial size compatible with the /8 downsampling + unpool/skip wiring is a
    # multiple of 32; use 64x64, batch 2 (training-mode BN needs >1 value per channel).
    x = jax.random.normal(jax.random.PRNGKey(0), (2, 4, 64, 64), dtype=jnp.float32)

    out = resnet_forward(enc_params, dec_params, x)
    out = jax.block_until_ready(out)
    assert out.shape == (2, 1, 64, 64), out.shape
    assert bool(jnp.all(jnp.isfinite(out)))
    print("KERNEL_OK")
</pallas_src>

<mosaic_0001>
module attributes {stable_mosaic.version = 11 : i64} {
  func.func @_matmul_bias_stats_kernel(%arg0: i32, %arg1: i32, %arg2: i32, %arg3: memref<256x256xbf16, #tpu.memory_space<vmem>>, %arg4: memref<256x128xbf16, #tpu.memory_space<vmem>>, %arg5: memref<1x128xf32, #tpu.memory_space<vmem>>, %arg6: memref<256x128xf32, #tpu.memory_space<vmem>>, %arg7: memref<1x128xf32, #tpu.memory_space<vmem>>, %arg8: memref<1x128xf32, #tpu.memory_space<vmem>>, %arg9: memref<256x128xf32, #tpu.memory_space<vmem>>, %arg10: memref<1x128xf32, #tpu.memory_space<vmem>>, %arg11: memref<1x128xf32, #tpu.memory_space<vmem>>) attributes {dimension_semantics = [#tpu.dimension_semantics<parallel>, #tpu.dimension_semantics<arbitrary>, #tpu.dimension_semantics<arbitrary>], iteration_bounds = array<i64: 1, 8, 1>, scalar_prefetch = 0 : i64, scratch_operands = 3 : i64, tpu.core_type = #tpu.core_type<tc>, window_params = [{transform_indices = @transform_0, window_bounds = array<i64: 256, 256>}, {transform_indices = @transform_1, window_bounds = array<i64: 256, 128>}, {transform_indices = @transform_2, window_bounds = array<i64: 1, 128>}, {transform_indices = @transform_3, window_bounds = array<i64: 256, 128>}, {transform_indices = @transform_4, window_bounds = array<i64: 1, 128>}, {transform_indices = @transform_5, window_bounds = array<i64: 1, 128>}]} {
    %c0_i32 = arith.constant 0 : i32
    %0 = arith.cmpi eq, %arg2, %c0_i32 : i32
    %1 = arith.extui %0 : i1 to i32
    %c0_i32_0 = arith.constant 0 : i32
    %2 = arith.cmpi ne, %1, %c0_i32_0 : i32
    scf.if %2 {
      %c0_15 = arith.constant 0 : index
      %c0_16 = arith.constant 0 : index
      %22 = vector.load %arg5[%c0_15, %c0_16] : memref<1x128xf32, #tpu.memory_space<vmem>>, vector<1x128xf32>
      %23 = vector.shape_cast %22 : vector<1x128xf32> to vector<1x128xf32>
      %24 = vector.broadcast %23 : vector<1x128xf32> to vector<256x128xf32>
      %c0_17 = arith.constant 0 : index
      %c0_18 = arith.constant 0 : index
      %25 = vector.load %arg9[%c0_17, %c0_18] : memref<256x128xf32, #tpu.memory_space<vmem>>, vector<256x128xf32>
      tpu.vector_store %arg9[%c0_17, %c0_18], %24 {strides = array<i32>} : memref<256x128xf32, #tpu.memory_space<vmem>>, vector<256x128xf32>,
    } else {
    }
    %c0_i32_1 = arith.constant 0 : i32
    %3 = arith.cmpi eq, %arg1, %c0_i32_1 : i32
    %c0_i32_2 = arith.constant 0 : i32
    %4 = arith.cmpi eq, %arg2, %c0_i32_2 : i32
    %5 = arith.andi %3, %4 : i1
    %6 = arith.extui %5 : i1 to i32
    %c0_i32_3 = arith.constant 0 : i32
    %7 = arith.cmpi ne, %6, %c0_i32_3 : i32
    scf.if %7 {
      %cst_15 = arith.constant 0.000000e+00 : f32
      %22 = vector.broadcast %cst_15 : f32 to vector<1x128xf32>
      %c0_16 = arith.constant 0 : index
      %c0_17 = arith.constant 0 : index
      %23 = vector.load %arg10[%c0_16, %c0_17] : memref<1x128xf32, #tpu.memory_space<vmem>>, vector<1x128xf32>
      tpu.vector_store %arg10[%c0_16, %c0_17], %22 {strides = array<i32>} : memref<1x128xf32, #tpu.memory_space<vmem>>, vector<1x128xf32>,
      %cst_18 = arith.constant 0.000000e+00 : f32
      %24 = vector.broadcast %cst_18 : f32 to vector<1x128xf32>
      %c0_19 = arith.constant 0 : index
      %c0_20 = arith.constant 0 : index
      %25 = vector.load %arg11[%c0_19, %c0_20] : memref<1x128xf32, #tpu.memory_space<vmem>>, vector<1x128xf32>
      tpu.vector_store %arg11[%c0_19, %c0_20], %24 {strides = array<i32>} : memref<1x128xf32, #tpu.memory_space<vmem>>, vector<1x128xf32>,
    } else {
    }
    %c0 = arith.constant 0 : index
    %c0_4 = arith.constant 0 : index
    %8 = vector.load %arg9[%c0, %c0_4] : memref<256x128xf32, #tpu.memory_space<vmem>>, vector<256x128xf32>
    %c0_5 = arith.constant 0 : index
    %c0_6 = arith.constant 0 : index
    %9 = vector.load %arg3[%c0_5, %c0_6] : memref<256x256xbf16, #tpu.memory_space<vmem>>, vector<256x256xbf16>
    %c0_7 = arith.constant 0 : index
    %c0_8 = arith.constant 0 : index
    %10 = vector.load %arg4[%c0_7, %c0_8] : memref<256x128xbf16, #tpu.memory_space<vmem>>, vector<256x128xbf16>
    %cst = arith.constant dense<0.000000e+00> : vector<256x128xf32>
    %11 = tpu.matmul %9, %10, %cst {dimension_numbers = #tpu.dot_dimension_numbers<[1], [0], [0], [1], [0, 0, 1, 1], [], []>} : vector<256x256xbf16>, vector<256x128xbf16>, vector<256x128xf32> -> vector<256x128xf32>
    %12 = arith.addf %8, %11 : vector<256x128xf32>
    %c0_9 = arith.constant 0 : index
    %c0_10 = arith.constant 0 : index
    %13 = vector.load %arg9[%c0_9, %c0_10] : memref<256x128xf32, #tpu.memory_space<vmem>>, vector<256x128xf32>
    tpu.vector_store %arg9[%c0_9, %c0_10], %12 {strides = array<i32>} : memref<256x128xf32, #tpu.memory_space<vmem>>, vector<256x128xf32>,
    %c0_i32_11 = arith.constant 0 : i32
    %14 = arith.cmpi eq, %arg2, %c0_i32_11 : i32
    %15 = arith.extui %14 : i1 to i32
    %c0_i32_12 = arith.constant 0 : i32
    %16 = arith.cmpi ne, %15, %c0_i32_12 : i32
    scf.if %16 {
      %c0_15 = arith.constant 0 : index
      %c0_16 = arith.constant 0 : index
      %22 = vector.load %arg9[%c0_15, %c0_16] : memref<256x128xf32, #tpu.memory_space<vmem>>, vector<256x128xf32>
      %c0_17 = arith.constant 0 : index
      %c0_18 = arith.constant 0 : index
      %23 = vector.load %arg6[%c0_17, %c0_18] : memref<256x128xf32, #tpu.memory_space<vmem>>, vector<256x128xf32>
      tpu.vector_store %arg6[%c0_17, %c0_18], %22 {strides = array<i32>} : memref<256x128xf32, #tpu.memory_space<vmem>>, vector<256x128xf32>,
      %c0_19 = arith.constant 0 : index
      %c0_20 = arith.constant 0 : index
      %24 = vector.load %arg10[%c0_19, %c0_20] : memref<1x128xf32, #tpu.memory_space<vmem>>, vector<1x128xf32>
      %cst_21 = arith.constant dense<0.000000e+00> : vector<128xf32>
      %25 = vector.multi_reduction <add>, %22, %cst_21 [0] : vector<256x128xf32> to vector<128xf32>
      %26 = vector.shape_cast %25 : vector<128xf32> to vector<1x128xf32>
      %27 = arith.addf %24, %26 : vector<1x128xf32>
      %c0_22 = arith.constant 0 : index
      %c0_23 = arith.constant 0 : index
      %28 = vector.load %arg10[%c0_22, %c0_23] : memref<1x128xf32, #tpu.memory_space<vmem>>, vector<1x128xf32>
      tpu.vector_store %arg10[%c0_22, %c0_23], %27 {strides = array<i32>} : memref<1x128xf32, #tpu.memory_space<vmem>>, vector<1x128xf32>,
      %c0_24 = arith.constant 0 : index
      %c0_25 = arith.constant 0 : index
      %29 = vector.load %arg11[%c0_24, %c0_25] : memref<1x128xf32, #tpu.memory_space<vmem>>, vector<1x128xf32>
      %30 = arith.mulf %22, %22 : vector<256x128xf32>
      %cst_26 = arith.constant dense<0.000000e+00> : vector<128xf32>
      %31 = vector.multi_reduction <add>, %30, %cst_26 [0] : vector<256x128xf32> to vector<128xf32>
      %32 = vector.shape_cast %31 : vector<128xf32> to vector<1x128xf32>
      %33 = arith.addf %29, %32 : vector<1x128xf32>
      %c0_27 = arith.constant 0 : index
      %c0_28 = arith.constant 0 : index
      %34 = vector.load %arg11[%c0_27, %c0_28] : memref<1x128xf32, #tpu.memory_space<vmem>>, vector<1x128xf32>
      tpu.vector_store %arg11[%c0_27, %c0_28], %33 {strides = array<i32>} : memref<1x128xf32, #tpu.memory_space<vmem>>, vector<1x128xf32>,
    } else {
    }
    %c7_i32 = arith.constant 7 : i32
    %17 = arith.cmpi eq, %arg1, %c7_i32 : i32
    %c0_i32_13 = arith.constant 0 : i32
    %18 = arith.cmpi eq, %arg2, %c0_i32_13 : i32
    %19 = arith.andi %17, %18 : i1
    %20 = arith.extui %19 : i1 to i32
    %c0_i32_14 = arith.constant 0 : i32
    %21 = arith.cmpi ne, %20, %c0_i32_14 : i32
    scf.if %21 {
      %c0_15 = arith.constant 0 : index
      %c0_16 = arith.constant 0 : index
      %22 = vector.load %arg10[%c0_15, %c0_16] : memref<1x128xf32, #tpu.memory_space<vmem>>, vector<1x128xf32>
      %c0_17 = arith.constant 0 : index
      %c0_18 = arith.constant 0 : index
      %23 = vector.load %arg7[%c0_17, %c0_18] : memref<1x128xf32, #tpu.memory_space<vmem>>, vector<1x128xf32>
      tpu.vector_store %arg7[%c0_17, %c0_18], %22 {strides = array<i32>} : memref<1x128xf32, #tpu.memory_space<vmem>>, vector<1x128xf32>,
      %c0_19 = arith.constant 0 : index
      %c0_20 = arith.constant 0 : index
      %24 = vector.load %arg11[%c0_19, %c0_20] : memref<1x128xf32, #tpu.memory_space<vmem>>, vector<1x128xf32>
      %c0_21 = arith.constant 0 : index
      %c0_22 = arith.constant 0 : index
      %25 = vector.load %arg8[%c0_21, %c0_22] : memref<1x128xf32, #tpu.memory_space<vmem>>, vector<1x128xf32>
      tpu.vector_store %arg8[%c0_21, %c0_22], %24 {strides = array<i32>} : memref<1x128xf32, #tpu.memory_space<vmem>>, vector<1x128xf32>,
    } else {
    }
    return
  }
  func.func @transform_0(%arg0: i32, %arg1: i32, %arg2: i32) -> (i32, i32) {
    %c0_i32 = arith.constant 0 : i32
    return %arg1, %arg2 : i32, i32
  }
  func.func @transform_1(%arg0: i32, %arg1: i32, %arg2: i32) -> (i32, i32) {
    %c0_i32 = arith.constant 0 : i32
    return %arg2, %arg0 : i32, i32
  }
  func.func @transform_2(%arg0: i32, %arg1: i32, %arg2: i32) -> (i32, i32) {
    %c0_i32 = arith.constant 0 : i32
    %c0_i32_0 = arith.constant 0 : i32
    return %c0_i32, %arg0 : i32, i32
  }
  func.func @transform_3(%arg0: i32, %arg1: i32, %arg2: i32) -> (i32, i32) {
    %c0_i32 = arith.constant 0 : i32
    return %arg1, %arg0 : i32, i32
  }
  func.func @transform_4(%arg0: i32, %arg1: i32, %arg2: i32) -> (i32, i32) {
    %c0_i32 = arith.constant 0 : i32
    %c0_i32_0 = arith.constant 0 : i32
    return %c0_i32, %arg0 : i32, i32
  }
  func.func @transform_5(%arg0: i32, %arg1: i32, %arg2: i32) -> (i32, i32) {
    %c0_i32 = arith.constant 0 : i32
    %c0_i32_0 = arith.constant 0 : i32
    return %c0_i32, %arg0 : i32, i32
  }
}

</mosaic_0001>

<bundles_post_ra>
// kernel: _conv2d_nhwc.1
= control target key start
LH: loop header
LB: loop body
LE: loop exit
PB: predicated region body
PF: predicated region fallthrough
CT: control target
= control target key end

     0   :  { %11 = vsyncpa [#allocation6], 0  ;;  %s2203_s0 = inlined_call_operand.vmem [shape: bf16[2048,256], index: 0, kind: input, shape index: {}]   ;;  %s2204_s1 = inlined_call_operand.vmem [shape: bf16[256,128], index: 1, kind: input, shape index: {}]   ;;  %s2205_s2 = inlined_call_operand.vmem [shape: f32[1,128], index: 2, kind: input, shape index: {}]   ;;  %s2206_s3 = inlined_call_operand.hbm [shape: f32[2048,128], index: 3, kind: output, shape index: {0}]   ;;  %s2207_s4 = inlined_call_operand.vmem [shape: f32[1,128], index: 4, kind: output, shape index: {1}]   ;;  %s2208_s5 = inlined_call_operand.vmem [shape: f32[1,128], index: 5, kind: output, shape index: {2}]  }
   0x1   :  { %13 = vsyncpa [#allocation6 + $0x1], 0  ;;  %s1783_s18 = smov 0   ;;  %s1785_s19 = smov 0  }
   0x2   :  { %s1787_s20 = smov 0   ;;  %s1789_s21 = smov 0  }
   0x3   :  { %s1791_s22 = smov 0   ;;  %s1793_s23 = smov 0  }
   0x4 LB: > { %s1331_s24 = sadd.s32 4294967295, %s1748_s23   ;;  %s1332_s25 = sadd.s32 4294967294, %s1748_s23   ;;  %s1748_s23 = sphi %s1793_s23, %s19_s23   ;;  %s1744_s22 = sphi %s1791_s22, %s2215_s22   ;;  %s1740_s21 = sphi %s1789_s21, %s2214_s21   ;;  %s1736_s20 = sphi %s1787_s20, %s2213_s20   ;;  %s1732_s19 = sphi %s1785_s19, %s2212_s19   ;;  %s1728_s18 = sphi %s1783_s18, %s2211_s18  }
   0x5   : > { %s34_s26 = sadd.s32 1, %s1744_s22  ;;  %s129_s27 = sadd.s32 1, %s1736_s20 }
   0x6   : > { %p36_p0 = scmp.ge.s32.totalorder %s34_s26, 8  ;;  %p139_p1 = scmp.ne.s32.totalorder %s1736_s20, %s1732_s19 }
   0x7   : > { %p140_p2 = scmp.eq.s32.totalorder %s1331_s24, 7  ;;  %p145_p3 = scmp.ne.s32.totalorder %s1732_s19, %s1728_s18 }
   0x8   : > { %s2217_s26 = smov (%p36_p0, %s34_s26), 0  ;;  %p146_p5 = scmp.eq.s32.totalorder %s1332_s25, 7 }
   0x9   : > { %p1823_p4 = por %p140_p2, %p139_p1  ;;  %s124_s29 = ssub.s32 %s1744_s22, %s2217_s26 }
   0xa   : > { %p1337_p6 = scmp.ge.s32.totalorder %s1748_s23, 1  ;;  %p127_p7 = scmp.eq.s32.totalorder %s124_s29, 0 }
   0xb   : > { %p1830_p8 = por %p146_p5, %p145_p3  ;;  %p249_p9 = scmp.lt.s32.totalorder %s1748_s23, 9 }
   0xc   : > { %s1836_s6 = scalar_select %p127_p7, %s1736_s20, %s129_s27  }
   0xd   : > { %p250_p10 = pnand %p1337_p6, %p249_p9 }
   0xe   : > { %s286_s7 = sand.u32 (!%p250_p10), 1, %s1732_s19   ;;  %s1339_s8 = sshll.u32 (!%p250_p10), %s1740_s21, 5 }
   0xf   : > { %253 = sbr.rel (%p250_p10) target bundleno = 413 (0x19d), region = 32  ;;  %s1845_s11 = sshll.u32 (!%p250_p10), %s286_s7, 8 }
  0x10   : > { %p301_p11 = scmp.lt.s32.totalorder (!%p250_p10), %s1339_s8, 255  ;;  %p370_p12 = scmp.eq.s32.totalorder (!%p250_p10), %s1740_s21, 0 }
  0x11   : > { %s1854_s16 = scalar_lea.vmem (!%p250_p10), [#allocation5], %s1845_s11 }
  0x14   : > { %v1669_v0 = vld [vmem:[%s2205_s2] ss:$0 sm:$0xff]  ;;  %s2219_s8 = smov (!%p301_p11, %s1339_s8), 255  ;;  %v1750_v1 = vmov (%p370_p12), 0.0  }
  0x15   : > { %338 = vst [vmem:[#allocation2 + $0xb0] sm:$0xff] %v1669_v0  ;;  %s1543_s12 = sshll.u32 %s2219_s8, 3 }
  0x16   : > { %339 = vst [vmem:[#allocation2] sm:$0xff] %v1669_v0  ;;  %s1851_s15 = scalar_lea.vmem %s2203_s0, %s1543_s12 }
  0x17   : > { %340 = vst [vmem:[#allocation2 + $0xd8] sm:$0xff] %v1669_v0 }
  0x18   : > { %341 = vst [vmem:[#allocation2 + $0x18] sm:$0xff] %v1669_v0 }
  0x19   : > { %342 = vst [vmem:[#allocation2 + $0x50] sm:$0xff] %v1669_v0 }
  0x1a   : > { %343 = vst [vmem:[#allocation2 + $0x68] sm:$0xff] %v1669_v0 }
  0x1b   : > { %344 = vst [vmem:[#allocation2 + $0x30] sm:$0xff] %v1669_v0 }
  0x1c   : > { %345 = vst [vmem:[#allocation2 + $0x48] sm:$0xff] %v1669_v0 }
  0x1d   : > { %346 = vst [vmem:[#allocation2 + $0x80] sm:$0xff] %v1669_v0 }
  0x1e   : > { %347 = vst [vmem:[#allocation2 + $0x88] sm:$0xff] %v1669_v0 }
  0x1f   : > { %348 = vst [vmem:[#allocation2 + $0xe8] sm:$0xff] %v1669_v0 }
  0x20   : > { %349 = vst [vmem:[#allocation2 + $0xb8] sm:$0xff] %v1669_v0 }
  0x21   : > { %350 = vst [vmem:[#allocation2 + $0x60] sm:$0xff] %v1669_v0 }
  0x22   : > { %351 = vst [vmem:[#allocation2 + $0xf0] sm:$0xff] %v1669_v0 }
  0x23   : > { %352 = vst [vmem:[#allocation2 + $0x8] sm:$0xff] %v1669_v0 }
  0x24   : > { %353 = vst [vmem:[#allocation2 + $0x78] sm:$0xff] %v1669_v0 }
  0x25   : > { %354 = vst [vmem:[#allocation2 + $0x38] sm:$0xff] %v1669_v0 }
  0x26   : > { %355 = vst [vmem:[#allocation2 + $0x58] sm:$0xff] %v1669_v0 }
  0x27   : > { %356 = vst [vmem:[#allocation2 + $0x40] sm:$0xff] %v1669_v0 }
  0x28   : > { %357 = vst [vmem:[#allocation2 + $0xc8] sm:$0xff] %v1669_v0 }
  0x29   : > { %358 = vst [vmem:[#allocation2 + $0xe0] sm:$0xff] %v1669_v0 }
  0x2a   : > { %359 = vst [vmem:[#allocation2 + $0x90] sm:$0xff] %v1669_v0 }
  0x2b   : > { %360 = vst [vmem:[#allocation2 + $0x70] sm:$0xff] %v1669_v0 }
  0x2c   : > { %361 = vst [vmem:[#allocation2 + $0xc0] sm:$0xff] %v1669_v0 }
  0x2d   : > { %362 = vst [vmem:[#allocation2 + $0xa8] sm:$0xff] %v1669_v0 }
  0x2e   : > { %363 = vst [vmem:[#allocation2 + $0xd0] sm:$0xff] %v1669_v0 }
  0x2f   : > { %364 = vst [vmem:[#allocation2 + $0x10] sm:$0xff] %v1669_v0 }
  0x30   : > { %365 = vst [vmem:[#allocation2 + $0x28] sm:$0xff] %v1669_v0  ;;  %374 = sbr.rel (!%p370_p12) target bundleno = 55 (0x37), region = 40 }
  0x31   : > { %366 = vst [vmem:[#allocation2 + $0xa0] sm:$0xff] %v1669_v0 }
  0x32   : > { %367 = vst [vmem:[#allocation2 + $0xf8] sm:$0xff] %v1669_v0 }
  0x33   : > { %368 = vst [vmem:[#allocation2 + $0x20] sm:$0xff] %v1669_v0 }
  0x34   : > { %369 = vst [vmem:[#allocation2 + $0x98] sm:$0xff] %v1669_v0 }
  0x35   : > { %375 = vst [vmem:[#allocation3] sm:$0x1] %v1750_v1 }
  0x36   : > { %376 = vst [vmem:[#allocation4] sm:$0x1] %v1750_v1 }
  0x37 PF: > { %v1584_v2 = vld [vmem:[%s2204_s1 + $0x38] sm:$0xff]  ;;  %v1583_v4 = vld [vmem:[%s2204_s1 + $0x30] sm:$0xff]  ;;  %v1582_v6 = vld [vmem:[%s2204_s1 + $0x28] sm:$0xff]  ;;  %p1150_p13 = scmp.eq.s32.totalorder %s1740_s21, 7 }
  0x38   : > { %v1592_v3 = vld [vmem:[%s2204_s1 + $0x78] sm:$0xff]  ;;  %729 = vmatpush.bf16.msra.mxu0 %v1584_v2  ;;  %v1591_v5 = vld [vmem:[%s2204_s1 + $0x70] sm:$0xff]  ;;  %1595 = vmatpush.bf16.msra.mxu2 %v1584_v2  ;;  %v1590_v7 = vld [vmem:[%s2204_s1 + $0x68] sm:$0xff] }
  0x39   : > { %818 = vmatpush.bf16.msra.mxu1 %v1592_v3  ;;  %1603 = vmatpush.bf16.msra.mxu3 %v1592_v3  ;;  %v1581_v8 = vld [vmem:[%s2204_s1 + $0x20] sm:$0xff]  ;;  %v1580_v10 = vld [vmem:[%s2204_s1 + $0x18] sm:$0xff]  ;;  %v1579_v12 = vld [vmem:[%s2204_s1 + $0x10] sm:$0xff] }
  0x3a   : > { %v1589_v9 = vld [vmem:[%s2204_s1 + $0x60] sm:$0xff]  ;;  %v1588_v11 = vld [vmem:[%s2204_s1 + $0x58] sm:$0xff]  ;;  %v1587_v13 = vld [vmem:[%s2204_s1 + $0x50] sm:$0xff] }
  0x3b   : > { %v1578_v14 = vld [vmem:[%s2204_s1 + $0x8] sm:$0xff]  ;;  %v1577_v16 = vld [vmem:[%s2204_s1] sm:$0xff]  ;;  %v1353_v30 = vld [vmem:[%s1851_s15 + $0x10] sm:$0xf] }
  0x3c   : > { %730 = vmatpush.bf16.msra.mxu0 %v1583_v4  ;;  %1596 = vmatpush.bf16.msra.mxu2 %v1583_v4  ;;  %v1586_v15 = vld [vmem:[%s2204_s1 + $0x48] sm:$0xff]  ;;  %v1585_v17 = vld [vmem:[%s2204_s1 + $0x40] sm:$0xff]  ;;  %v1548_v31 = vld [vmem:[%s1851_s15 + $0x14] sm:$0xf0] }
  0x3d   : > { %819 = vmatpush.bf16.msra.mxu1 %v1591_v5  ;;  %1604 = vmatpush.bf16.msra.mxu3 %v1591_v5  ;;  %v1345_v18 = vld [vmem:[%s1851_s15] sm:$0xf]  ;;  %v1546_v19 = vld [vmem:[%s1851_s15 + $0x4] sm:$0xf0]  ;;  %v1545_v20 = vld [vmem:[%s1851_s15 + $0x4] sm:$0xf]  ;;  %v1354_v38 = vor.u32 %v1548_v31, %v1353_v30 }
  0x3e   : > { %v1347_v21 = vld [vmem:[%s1851_s15 + $0x8] sm:$0xf0]  ;;  %v1409_v22 = vld [vmem:[%s1851_s15 + $0x80] sm:$0xf]  ;;  %v1562_v23 = vld [vmem:[%s1851_s15 + $0x84] sm:$0xf0]  ;;  %v1346_v26 = vor.u32 %v1546_v19, %v1345_v18 }
  0x3f   : > { %v1561_v24 = vld [vmem:[%s1851_s15 + $0x84] sm:$0xf]  ;;  %v1411_v25 = vld [vmem:[%s1851_s15 + $0x88] sm:$0xf0]  ;;  %v1350_v27 = vor.u32 %v1545_v20, %v1347_v21  ;;  %v1410_v28 = vor.u32 %v1562_v23, %v1409_v22  ;;  %v1547_v32 = vld [vmem:[%s1851_s15 + $0x14] sm:$0xf] }
  0x40   : > { %731 = vmatpush.bf16.msra.mxu0 %v1582_v6  ;;  %1597 = vmatpush.bf16.msra.mxu2 %v1582_v6  ;;  %v1414_v29 = vor.u32 %v1561_v24, %v1411_v25  ;;  %v1355_v33 = vld [vmem:[%s1851_s15 + $0x18] sm:$0xf0]  ;;  %v1417_v34 = vld [vmem:[%s1851_s15 + $0x90] sm:$0xf]  ;;  %v1564_v35 = vld [vmem:[%s1851_s15 + $0x94] sm:$0xf0] }
  0x41   : > { %820 = vmatpush.bf16.msra.mxu1 %v1590_v7  ;;  %1605 = vmatpush.bf16.msra.mxu3 %v1590_v7  ;;  %v1563_v36 = vld [vmem:[%s1851_s15 + $0x94] sm:$0xf]  ;;  %v1419_v37 = vld [vmem:[%s1851_s15 + $0x98] sm:$0xf0]  ;;  %v1358_v39 = vor.u32 %v1547_v32, %v1355_v33  ;;  %v1418_v40 = vor.u32 %v1564_v35, %v1417_v34  ;;  %v1361_v42 = vld [vmem:[%s1851_s15 + $0x20] sm:$0xf] }
  0x42   : > { %v1422_v41 = vor.u32 %v1563_v36, %v1419_v37  ;;  %v1550_v43 = vld [vmem:[%s1851_s15 + $0x24] sm:$0xf0]  ;;  %v1549_v44 = vld [vmem:[%s1851_s15 + $0x24] sm:$0xf]  ;;  %v1363_v45 = vld [vmem:[%s1851_s15 + $0x28] sm:$0xf0] }
  0x43   : > { %v1425_v46 = vld [vmem:[%s1851_s15 + $0xa0] sm:$0xf]  ;;  %v1566_v47 = vld [vmem:[%s1851_s15 + $0xa4] sm:$0xf0]  ;;  %v1565_v48 = vld [vmem:[%s1851_s15 + $0xa4] sm:$0xf]  ;;  %v1362_v50 = vor.u32 %v1550_v43, %v1361_v42  ;;  %v1366_v51 = vor.u32 %v1549_v44, %v1363_v45 }
  0x44   : > { %732 = vmatpush.bf16.msra.mxu0 %v1581_v8  ;;  %1598 = vmatpush.bf16.msra.mxu2 %v1581_v8  ;;  %v1427_v49 = vld [vmem:[%s1851_s15 + $0xa8] sm:$0xf0]  ;;  %v1426_v52 = vor.u32 %v1566_v47, %v1425_v46  ;;  %v1369_v54 = vld [vmem:[%s1851_s15 + $0x30] sm:$0xf]  ;;  %v1552_v55 = vld [vmem:[%s1851_s15 + $0x34] sm:$0xf0] }
  0x45   : > { %821 = vmatpush.bf16.msra.mxu1 %v1589_v9  ;;  %1606 = vmatpush.bf16.msra.mxu3 %v1589_v9  ;;  %v1430_v53 = vor.u32 %v1565_v48, %v1427_v49  ;;  %v1551_v56 = vld [vmem:[%s1851_s15 + $0x34] sm:$0xf]  ;;  %v1371_v57 = vld [vmem:[%s1851_s15 + $0x38] sm:$0xf0]  ;;  %v1433_v58 = vld [vmem:[%s1851_s15 + $0xb0] sm:$0xf]  ;;  %v1370_v62 = vor.u32 %v1552_v55, %v1369_v54 }
  0x46   : > { %v1568_v59 = vld [vmem:[%s1851_s15 + $0xb4] sm:$0xf0]  ;;  %v1567_v60 = vld [vmem:[%s1851_s15 + $0xb4] sm:$0xf]  ;;  %v1435_v61 = vld [vmem:[%s1851_s15 + $0xb8] sm:$0xf0]  ;;  %v1374_v63 = vor.u32 %v1551_v56, %v1371_v57 }
  0x47   : > { %v1434_v0 = vor.u32 %v1568_v59, %v1433_v58  ;;  %v1438_v1 = vor.u32 %v1567_v60, %v1435_v61  ;;  %v1377_v2 = vld [vmem:[%s1851_s15 + $0x40] sm:$0xf]  ;;  %v1554_v3 = vld [vmem:[%s1851_s15 + $0x44] sm:$0xf0]  ;;  %v1553_v4 = vld [vmem:[%s1851_s15 + $0x44] sm:$0xf] }
  0x48   : > { %733 = vmatpush.bf16.msra.mxu0 %v1580_v10  ;;  %1599 = vmatpush.bf16.msra.mxu2 %v1580_v10  ;;  %v1379_v5 = vld [vmem:[%s1851_s15 + $0x48] sm:$0xf0]  ;;  %v1441_v6 = vld [vmem:[%s1851_s15 + $0xc0] sm:$0xf]  ;;  %v1570_v7 = vld [vmem:[%s1851_s15 + $0xc4] sm:$0xf0]  ;;  %v1378_v10 = vor.u32 %v1554_v3, %v1377_v2 }
  0x49   : > { %822 = vmatpush.bf16.msra.mxu1 %v1588_v11  ;;  %1607 = vmatpush.bf16.msra.mxu3 %v1588_v11  ;;  %v1569_v8 = vld [vmem:[%s1851_s15 + $0xc4] sm:$0xf]  ;;  %v1443_v9 = vld [vmem:[%s1851_s15 + $0xc8] sm:$0xf0]  ;;  %v1382_v11 = vor.u32 %v1553_v4, %v1379_v5  ;;  %v1449_v18 = vld [vmem:[%s1851_s15 + $0xd0] sm:$0xf] }
  0x4a   : > { %v1572_v19 = vld [vmem:[%s1851_s15 + $0xd4] sm:$0xf0]  ;;  %v1571_v20 = vld [vmem:[%s1851_s15 + $0xd4] sm:$0xf]  ;;  %v1451_v21 = vld [vmem:[%s1851_s15 + $0xd8] sm:$0xf0] }
  0x4b   : > { %v1450_v24 = vor.u32 %v1572_v19, %v1449_v18  ;;  %v1454_v25 = vor.u32 %v1571_v20, %v1451_v21  ;;  %v1457_v30 = vld [vmem:[%s1851_s15 + $0xe0] sm:$0xf]  ;;  %v1574_v31 = vld [vmem:[%s1851_s15 + $0xe4] sm:$0xf0]  ;;  %v1573_v32 = vld [vmem:[%s1851_s15 + $0xe4] sm:$0xf] }
  0x4c   : > { %734 = vmatpush.bf16.msra.mxu0 %v1579_v12  ;;  %1600 = vmatpush.bf16.msra.mxu2 %v1579_v12  ;;  %v1442_v12 = vor.u32 %v1570_v7, %v1441_v6  ;;  %v1459_v33 = vld [vmem:[%s1851_s15 + $0xe8] sm:$0xf0]  ;;  %v1458_v36 = vor.u32 %v1574_v31, %v1457_v30  ;;  %v1465_v42 = vld [vmem:[%s1851_s15 + $0xf0] sm:$0xf]  ;;  %v1576_v43 = vld [vmem:[%s1851_s15 + $0xf4] sm:$0xf0] }
  0x4d   : > { %823 = vmatpush.bf16.msra.mxu1 %v1587_v13  ;;  %1608 = vmatpush.bf16.msra.mxu3 %v1587_v13  ;;  %v1446_v13 = vor.u32 %v1569_v8, %v1443_v9  ;;  %v1462_v37 = vor.u32 %v1573_v32, %v1459_v33  ;;  %v1575_v44 = vld [vmem:[%s1851_s15 + $0xf4] sm:$0xf]  ;;  %v1467_v45 = vld [vmem:[%s1851_s15 + $0xf8] sm:$0xf0]  ;;  %v1466_v48 = vor.u32 %v1576_v43, %v1465_v42  ;;  %v378_v59 = vld [vmem:[#allocation2] sm:$0xff] }
  0x4e   : > { %v1470_v49 = vor.u32 %v1575_v44, %v1467_v45  ;;  %v393_v56 = vld [vmem:[#allocation2 + $0x38] sm:$0xff]  ;;  %v395_v19 = vld [vmem:[#allocation2 + $0x40] sm:$0xff]  ;;  %v396_v32 = vld [vmem:[#allocation2 + $0xc8] sm:$0xff] }
  0x4f   : > { %v394_v6 = vld [vmem:[#allocation2 + $0x58] sm:$0xff]  ;;  %v397_v45 = vld [vmem:[#allocation2 + $0xe0] sm:$0xff] }
  0x50   : > { %735 = vmatpush.bf16.msra.mxu0 %v1578_v14  ;;  %1601 = vmatpush.bf16.msra.mxu2 %v1578_v14  ;;  %v1385_v14 = vld [vmem:[%s1851_s15 + $0x50] sm:$0xf]  ;;  %v379_v9 = vld [vmem:[#allocation2 + $0xd8] sm:$0xff] }
  0x51   : > { %824 = vmatpush.bf16.msra.mxu1 %v1586_v15  ;;  %1609 = vmatpush.bf16.msra.mxu3 %v1586_v15  ;;  %v1556_v15 = vld [vmem:[%s1851_s15 + $0x54] sm:$0xf0] }
  0x52   : > { %v1386_v22 = vor.u32 %v1556_v15, %v1385_v14 }
  0x54   : > { %736 = vmatpush.bf16.msra.mxu0 %v1577_v16  ;;  %1602 = vmatpush.bf16.msra.mxu2 %v1577_v16  ;;  %v1555_v16 = vld [vmem:[%s1851_s15 + $0x54] sm:$0xf] }
  0x55   : > { %825 = vmatpush.bf16.msra.mxu1 %v1585_v17  ;;  %1610 = vmatpush.bf16.msra.mxu3 %v1585_v17  ;;  %v1387_v17 = vld [vmem:[%s1851_s15 + $0x58] sm:$0xf0] }
  0x56   : > { %v1390_v23 = vor.u32 %v1555_v16, %v1387_v17 }
  0x57   : > { %737 = vmatmul.bf16.vlgmr.msra.gmra.mxu0 %v1346_v26  ;;  %777 = vmatmul.bf16.vlgmr.msra.gmra.mxu2 %v1410_v28  ;;  %v1393_v26 = vld [vmem:[%s1851_s15 + $0x60] sm:$0xf]  ;;  %v1557_v28 = vld [vmem:[%s1851_s15 + $0x64] sm:$0xf] }
  0x58   : > { %826 = vmatmul.bf16.vlgmr.msra.gmra.mxu1 %v1350_v27  ;;  %866 = vmatmul.bf16.vlgmr.msra.gmra.mxu3 %v1414_v29  ;;  %v1558_v27 = vld [vmem:[%s1851_s15 + $0x64] sm:$0xf0]  ;;  %v1395_v29 = vld [vmem:[%s1851_s15 + $0x68] sm:$0xf0] }
  0x59   : > { %v1394_v34 = vor.u32 %v1558_v27, %v1393_v26  ;;  %v1398_v35 = vor.u32 %v1557_v28, %v1395_v29 }
  0x67   : > { %742 = vmatmul.bf16.gmra.mxu0 %v1354_v38  ;;  %782 = vmatmul.bf16.gmra.mxu2 %v1418_v40  ;;  %v1401_v38 = vld [vmem:[%s1851_s15 + $0x70] sm:$0xf]  ;;  %v1559_v40 = vld [vmem:[%s1851_s15 + $0x74] sm:$0xf] }
  0x68   : > { %831 = vmatmul.bf16.gmra.mxu1 %v1358_v39  ;;  %871 = vmatmul.bf16.gmra.mxu3 %v1422_v41  ;;  %v1560_v39 = vld [vmem:[%s1851_s15 + $0x74] sm:$0xf0]  ;;  %v1403_v41 = vld [vmem:[%s1851_s15 + $0x78] sm:$0xf0] }
  0x69   : > { %v1402_v46 = vor.u32 %v1560_v39, %v1401_v38  ;;  %v1406_v47 = vor.u32 %v1559_v40, %v1403_v41 }
  0x77   : > { %747 = vmatmul.bf16.gmra.mxu0 %v1362_v50  ;;  %787 = vmatmul.bf16.gmra.mxu2 %v1426_v52 }
  0x78   : > { %836 = vmatmul.bf16.gmra.mxu1 %v1366_v51  ;;  %876 = vmatmul.bf16.gmra.mxu3 %v1430_v53  ;;  %v377_v51 = vld [vmem:[#allocation2 + $0xb0] sm:$0xff] }
  0x87   : > { %752 = vmatmul.bf16.gmra.mxu0 %v1370_v62  ;;  %792 = vmatmul.bf16.gmra.mxu2 %v1434_v0 }
  0x88   : > { %841 = vmatmul.bf16.gmra.mxu1 %v1374_v63  ;;  %881 = vmatmul.bf16.gmra.mxu3 %v1438_v1 }
  0x97   : > { %757 = vmatmul.bf16.gmra.mxu0 %v1378_v10  ;;  %797 = vmatmul.bf16.gmra.mxu2 %v1442_v12 }
  0x98   : > { %846 = vmatmul.bf16.gmra.mxu1 %v1382_v11  ;;  %886 = vmatmul.bf16.gmra.mxu3 %v1446_v13 }
  0xa7   : > { %762 = vmatmul.bf16.gmra.mxu0 %v1386_v22  ;;  %802 = vmatmul.bf16.gmra.mxu2 %v1450_v24  ;;  %v380_v22 = vld [vmem:[#allocation2 + $0x18] sm:$0xff] }
  0xa8   : > { %851 = vmatmul.bf16.gmra.mxu1 %v1390_v23  ;;  %891 = vmatmul.bf16.gmra.mxu3 %v1454_v25 }
  0xb7   : > { %767 = vmatmul.bf16.gmra.mxu0 %v1394_v34  ;;  %807 = vmatmul.bf16.gmra.mxu2 %v1458_v36 }
  0xb8   : > { %856 = vmatmul.bf16.gmra.mxu1 %v1398_v35  ;;  %896 = vmatmul.bf16.gmra.mxu3 %v1462_v37  ;;  %v381_v35 = vld [vmem:[#allocation2 + $0x50] sm:$0xff] }
  0xc7   : > { %772 = vmatmul.bf16.gmra.mxu0 %v1402_v46  ;;  %812 = vmatmul.bf16.gmra.mxu2 %v1466_v48  ;;  %v382_v48 = vld [vmem:[#allocation2 + $0x68] sm:$0xff] }
  0xc8   : > { %861 = vmatmul.bf16.gmra.mxu1 %v1406_v47  ;;  %901 = vmatmul.bf16.gmra.mxu3 %v1470_v49 }
  0xd4   : > { %v738_v50 = vpop.f32.mrf.mxu0 }
  0xd5   : > { %v827_v52 = vpop.f32.mrf.mxu1 }
  0xd6   : > { %v828_v53 = vadd.f32 %v827_v52, %v738_v50 }
  0xd8   : > { %v907_v54 = vadd.f32 %v828_v53, %v377_v51 }
  0xda   : > { %939 = vst [vmem:[#allocation2 + $0xb0] sm:$0xff] %v907_v54  ;;  %v778_v55 = vpop.f32.mrf.mxu2  ;;  %v1079_v1 = vmul.f32 %v907_v54, %v907_v54 }
  0xdb   : > { %1006 = vst [vmem:[%s1854_s16] sm:$0xff] %v907_v54  ;;  %v867_v57 = vpop.f32.mrf.mxu3 }
  0xdc   : > { %v740_v58 = vpop.f32.mrf.mxu0  ;;  %v868_v61 = vadd.f32 %v867_v57, %v778_v55  ;;  %v398_v55 = vld [vmem:[#allocation2 + $0x90] sm:$0xff] }
  0xdd   : > { %v829_v60 = vpop.f32.mrf.mxu1 }
  0xde   : > { %v830_v62 = vadd.f32 %v829_v60, %v740_v58  ;;  %v1971_v63 = vadd.f32 %v868_v61, %v393_v56  ;;  %v383_v58 = vld [vmem:[#allocation2 + $0x30] sm:$0xff] }
  0xe0   : > { %v908_v0 = vadd.f32 %v830_v62, %v378_v59  ;;  %955 = vst [vmem:[#allocation2 + $0x38] sm:$0xff] %v1971_v63 }
  0xe1   : > { %1022 = vst [vmem:[%s1854_s16 + $0x80] sm:$0xff] %v1971_v63 }
  0xe2   : > { %940 = vst [vmem:[#allocation2] sm:$0xff] %v908_v0  ;;  %v1039_v2 = vadd.f32 %v908_v0, %v907_v54  ;;  %v1080_v3 = vmul.f32 %v908_v0, %v908_v0  ;;  %v780_v5 = vpop.f32.mrf.mxu2 }
  0xe3   : > { %1007 = vst [vmem:[%s1854_s16 + $0x8] sm:$0xff] %v908_v0  ;;  %v869_v7 = vpop.f32.mrf.mxu3 }
  0xe4   : > { %v1111_v4 = vadd.f32 %v1080_v3, %v1079_v1  ;;  %v743_v8 = vpop.f32.mrf.mxu0  ;;  %v870_v11 = vadd.f32 %v869_v7, %v780_v5  ;;  %v384_v5 = vld [vmem:[#allocation2 + $0x48] sm:$0xff] }
  0xe5   : > { %v832_v10 = vpop.f32.mrf.mxu1 }
  0xe6   : > { %v833_v12 = vadd.f32 %v832_v10, %v743_v8  ;;  %v1977_v13 = vadd.f32 %v870_v11, %v394_v6 }
  0xe8   : > { %v909_v14 = vadd.f32 %v833_v12, %v379_v9  ;;  %956 = vst [vmem:[#allocation2 + $0x58] sm:$0xff] %v1977_v13  ;;  %v400_v12 = vld [vmem:[#allocation2 + $0xc0] sm:$0xff] }
  0xe9   : > { %1023 = vst [vmem:[%s1854_s16 + $0x88] sm:$0xff] %v1977_v13 }
  0xea   : > { %941 = vst [vmem:[#allocation2 + $0xd8] sm:$0xff] %v909_v14  ;;  %v1040_v15 = vadd.f32 %v1039_v2, %v909_v14  ;;  %v1081_v16 = vmul.f32 %v909_v14, %v909_v14  ;;  %v783_v18 = vpop.f32.mrf.mxu2  ;;  %v399_v2 = vld [vmem:[#allocation2 + $0x70] sm:$0xff] }
  0xeb   : > { %1008 = vst [vmem:[%s1854_s16 + $0x10] sm:$0xff] %v909_v14  ;;  %v872_v20 = vpop.f32.mrf.mxu3 }
  0xec   : > { %v1112_v17 = vadd.f32 %v1111_v4, %v1081_v16  ;;  %v745_v21 = vpop.f32.mrf.mxu0  ;;  %v873_v24 = vadd.f32 %v872_v20, %v783_v18  ;;  %v385_v16 = vld [vmem:[#allocation2 + $0x80] sm:$0xff] }
  0xed   : > { %v834_v23 = vpop.f32.mrf.mxu1 }
  0xee   : > { %v835_v25 = vadd.f32 %v834_v23, %v745_v21  ;;  %v1983_v26 = vadd.f32 %v873_v24, %v395_v19  ;;  %v401_v23 = vld [vmem:[#allocation2 + $0xa8] sm:$0xff] }
  0xf0   : > { %v910_v27 = vadd.f32 %v835_v25, %v380_v22  ;;  %957 = vst [vmem:[#allocation2 + $0x40] sm:$0xff] %v1983_v26 }
  0xf1   : > { %1024 = vst [vmem:[%s1854_s16 + $0x90] sm:$0xff] %v1983_v26 }
  0xf2   : > { %942 = vst [vmem:[#allocation2 + $0x18] sm:$0xff] %v910_v27  ;;  %v1041_v28 = vadd.f32 %v1040_v15, %v910_v27  ;;  %v1082_v29 = vmul.f32 %v910_v27, %v910_v27  ;;  %v785_v31 = vpop.f32.mrf.mxu2 }
  0xf3   : > { %1009 = vst [vmem:[%s1854_s16 + $0x18] sm:$0xff] %v910_v27  ;;  %v874_v33 = vpop.f32.mrf.mxu3  ;;  %v386_v27 = vld [vmem:[#allocation2 + $0x88] sm:$0xff] }
  0xf4   : > { %v1113_v30 = vadd.f32 %v1112_v17, %v1082_v29  ;;  %v748_v34 = vpop.f32.mrf.mxu0  ;;  %v875_v37 = vadd.f32 %v874_v33, %v785_v31 }
  0xf5   : > { %v837_v36 = vpop.f32.mrf.mxu1 }
  0xf6   : > { %v838_v38 = vadd.f32 %v837_v36, %v748_v34  ;;  %v1989_v39 = vadd.f32 %v875_v37, %v396_v32  ;;  %v402_v34 = vld [vmem:[#allocation2 + $0xd0] sm:$0xff]  ;;  %v387_v37 = vld [vmem:[#allocation2 + $0xe8] sm:$0xff] }
  0xf8   : > { %v911_v40 = vadd.f32 %v838_v38, %v381_v35  ;;  %958 = vst [vmem:[#allocation2 + $0xc8] sm:$0xff] %v1989_v39 }
  0xf9   : > { %1025 = vst [vmem:[%s1854_s16 + $0x98] sm:$0xff] %v1989_v39 }
  0xfa   : > { %943 = vst [vmem:[#allocation2 + $0x50] sm:$0xff] %v911_v40  ;;  %v1992_v41 = vadd.f32 %v1041_v28, %v911_v40  ;;  %v1083_v42 = vmul.f32 %v911_v40, %v911_v40  ;;  %v788_v44 = vpop.f32.mrf.mxu2 }
  0xfb   : > { %1010 = vst [vmem:[%s1854_s16 + $0x20] sm:$0xff] %v911_v40  ;;  %v877_v46 = vpop.f32.mrf.mxu3 }
  0xfc   : > { %v1995_v43 = vadd.f32 %v1113_v30, %v1083_v42  ;;  %v750_v47 = vpop.f32.mrf.mxu0  ;;  %v878_v50 = vadd.f32 %v877_v46, %v788_v44 }
  0xfd   : > { %v839_v49 = vpop.f32.mrf.mxu1 }
  0xfe   : > { %v840_v51 = vadd.f32 %v839_v49, %v750_v47  ;;  %v1999_v52 = vadd.f32 %v878_v50, %v397_v45  ;;  %v403_v47 = vld [vmem:[#allocation2 + $0x10] sm:$0xff]  ;;  %v388_v50 = vld [vmem:[#allocation2 + $0xb8] sm:$0xff] }
 0x100   : > { %v2001_v53 = vadd.f32 %v840_v51, %v382_v48  ;;  %959 = vst [vmem:[#allocation2 + $0xe0] sm:$0xff] %v1999_v52 }
 0x101   : > { %1026 = vst [vmem:[%s1854_s16 + $0xa0] sm:$0xff] %v1999_v52 }
 0x102   : > { %944 = vst [vmem:[#allocation2 + $0x68] sm:$0xff] %v2001_v53  ;;  %v790_v54 = vpop.f32.mrf.mxu2 }
 0x103   : > { %1011 = vst [vmem:[%s1854_s16 + $0x28] sm:$0xff] %v2001_v53  ;;  %v879_v56 = vpop.f32.mrf.mxu3 }
 0x104   : > { %v753_v57 = vpop.f32.mrf.mxu0  ;;  %v880_v60 = vadd.f32 %v879_v56, %v790_v54 }
 0x105   : > { %v842_v59 = vpop.f32.mrf.mxu1 }
 0x106   : > { %v843_v61 = vadd.f32 %v842_v59, %v753_v57  ;;  %v2010_v62 = vadd.f32 %v880_v60, %v398_v55  ;;  %v404_v59 = vld [vmem:[#allocation2 + $0x28] sm:$0xff] }
 0x108   : > { %v2012_v0 = vadd.f32 %v843_v61, %v383_v58  ;;  %960 = vst [vmem:[#allocation2 + $0x90] sm:$0xff] %v2010_v62 }
 0x109   : > { %1027 = vst [vmem:[%s1854_s16 + $0xa8] sm:$0xff] %v2010_v62 }
 0x10a   : > { %945 = vst [vmem:[#allocation2 + $0x30] sm:$0xff] %v2012_v0  ;;  %v793_v1 = vpop.f32.mrf.mxu2 }
 0x10b   : > { %1012 = vst [vmem:[%s1854_s16 + $0x30] sm:$0xff] %v2012_v0  ;;  %v882_v3 = vpop.f32.mrf.mxu3 }
 0x10c   : > { %v755_v4 = vpop.f32.mrf.mxu0  ;;  %v883_v7 = vadd.f32 %v882_v3, %v793_v1  ;;  %v389_v1 = vld [vmem:[#allocation2 + $0x60] sm:$0xff] }
 0x10d   : > { %v844_v6 = vpop.f32.mrf.mxu1 }
 0x10e   : > { %v845_v8 = vadd.f32 %v844_v6, %v755_v4  ;;  %v2020_v9 = vadd.f32 %v883_v7, %v399_v2  ;;  %v1084_v7 = vmul.f32 %v2001_v53, %v2001_v53 }
 0x110   : > { %v2022_v10 = vadd.f32 %v845_v8, %v384_v5  ;;  %961 = vst [vmem:[#allocation2 + $0x70] sm:$0xff] %v2020_v9 }
 0x111   : > { %1028 = vst [vmem:[%s1854_s16 + $0xb0] sm:$0xff] %v2020_v9 }
 0x112   : > { %946 = vst [vmem:[#allocation2 + $0x48] sm:$0xff] %v2022_v10  ;;  %v795_v11 = vpop.f32.mrf.mxu2 }
 0x113   : > { %1013 = vst [vmem:[%s1854_s16 + $0x38] sm:$0xff] %v2022_v10  ;;  %v884_v14 = vpop.f32.mrf.mxu3 }
 0x114   : > { %v758_v15 = vpop.f32.mrf.mxu0  ;;  %v885_v18 = vadd.f32 %v884_v14, %v795_v11  ;;  %v405_v11 = vld [vmem:[#allocation2 + $0xa0] sm:$0xff] }
 0x115   : > { %v847_v17 = vpop.f32.mrf.mxu1 }
 0x116   : > { %v848_v19 = vadd.f32 %v847_v17, %v758_v15  ;;  %v2030_v20 = vadd.f32 %v885_v18, %v400_v12  ;;  %v390_v15 = vld [vmem:[#allocation2 + $0xf0] sm:$0xff]  ;;  %v1043_v18 = vadd.f32 %v1992_v41, %v2001_v53 }
 0x118   : > { %v2032_v21 = vadd.f32 %v848_v19, %v385_v16  ;;  %962 = vst [vmem:[#allocation2 + $0xc0] sm:$0xff] %v2030_v20  ;;  %v1085_v19 = vmul.f32 %v2012_v0, %v2012_v0 }
 0x119   : > { %1029 = vst [vmem:[%s1854_s16 + $0xb8] sm:$0xff] %v2030_v20 }
 0x11a   : > { %947 = vst [vmem:[#allocation2 + $0x80] sm:$0xff] %v2032_v21  ;;  %v798_v22 = vpop.f32.mrf.mxu2  ;;  %v1087_v53 = vmul.f32 %v2032_v21, %v2032_v21 }
 0x11b   : > { %1014 = vst [vmem:[%s1854_s16 + $0x40] sm:$0xff] %v2032_v21  ;;  %v887_v24 = vpop.f32.mrf.mxu3 }
 0x11c   : > { %v760_v25 = vpop.f32.mrf.mxu0  ;;  %v888_v29 = vadd.f32 %v887_v24, %v798_v22  ;;  %v1115_v24 = vadd.f32 %v1995_v43, %v1084_v7 }
 0x11d   : > { %v849_v28 = vpop.f32.mrf.mxu1 }
 0x11e   : > { %v850_v30 = vadd.f32 %v849_v28, %v760_v25  ;;  %v2040_v31 = vadd.f32 %v888_v29, %v401_v23  ;;  %v1044_v25 = vadd.f32 %v1043_v18, %v2012_v0  ;;  %v1116_v29 = vadd.f32 %v1115_v24, %v1085_v19 }
 0x120   : > { %v2042_v32 = vadd.f32 %v850_v30, %v386_v27  ;;  %963 = vst [vmem:[#allocation2 + $0xa8] sm:$0xff] %v2040_v31  ;;  %v1086_v27 = vmul.f32 %v2022_v10, %v2022_v10  ;;  %v1045_v41 = vadd.f32 %v1044_v25, %v2022_v10 }
 0x121   : > { %1030 = vst [vmem:[%s1854_s16 + $0xc0] sm:$0xff] %v2040_v31 }
 0x122   : > { %948 = vst [vmem:[#allocation2 + $0x88] sm:$0xff] %v2042_v32  ;;  %v800_v33 = vpop.f32.mrf.mxu2  ;;  %v1117_v30 = vadd.f32 %v1116_v29, %v1086_v27  ;;  %v1088_v43 = vmul.f32 %v2042_v32, %v2042_v32 }
 0x123   : > { %1015 = vst [vmem:[%s1854_s16 + $0x48] sm:$0xff] %v2042_v32  ;;  %v889_v35 = vpop.f32.mrf.mxu3 }
 0x124   : > { %v763_v36 = vpop.f32.mrf.mxu0  ;;  %v890_v40 = vadd.f32 %v889_v35, %v800_v33  ;;  %v1046_v33 = vadd.f32 %v1045_v41, %v2032_v21 }
 0x125   : > { %v852_v38 = vpop.f32.mrf.mxu1 }
 0x126   : > { %v853_v42 = vadd.f32 %v852_v38, %v763_v36  ;;  %v2050_v44 = vadd.f32 %v890_v40, %v402_v34  ;;  %v406_v34 = vld [vmem:[#allocation2 + $0xf8] sm:$0xff]  ;;  %v1118_v40 = vadd.f32 %v1117_v30, %v1087_v53  ;;  %v1096_v53 = vmul.f32 %v1977_v13, %v1977_v13 }
 0x128   : > { %v2052_v45 = vadd.f32 %v853_v42, %v387_v37  ;;  %964 = vst [vmem:[#allocation2 + $0xd0] sm:$0xff] %v2050_v44  ;;  %v391_v37 = vld [vmem:[#allocation2 + $0x8] sm:$0xff]  ;;  %v1047_v42 = vadd.f32 %v1046_v33, %v2042_v32 }
 0x129   : > { %1031 = vst [vmem:[%s1854_s16 + $0xc8] sm:$0xff] %v2050_v44 }
 0x12a   : > { %949 = vst [vmem:[#allocation2 + $0xe8] sm:$0xff] %v2052_v45  ;;  %v803_v46 = vpop.f32.mrf.mxu2 }
 0x12b   : > { %1016 = vst [vmem:[%s1854_s16 + $0x50] sm:$0xff] %v2052_v45  ;;  %v892_v48 = vpop.f32.mrf.mxu3 }
 0x12c   : > { %v765_v49 = vpop.f32.mrf.mxu0  ;;  %v893_v54 = vadd.f32 %v892_v48, %v803_v46  ;;  %v1089_v46 = vmul.f32 %v2052_v45, %v2052_v45  ;;  %v1119_v48 = vadd.f32 %v1118_v40, %v1088_v43  ;;  %v1100_v40 = vmul.f32 %v2010_v62, %v2010_v62 }
 0x12d   : > { %v854_v51 = vpop.f32.mrf.mxu1 }
 0x12e   : > { %v855_v55 = vadd.f32 %v854_v51, %v765_v49  ;;  %v2060_v56 = vadd.f32 %v893_v54, %v403_v47  ;;  %v1048_v49 = vadd.f32 %v1047_v42, %v2052_v45  ;;  %v1120_v54 = vadd.f32 %v1119_v48, %v1089_v46 }
 0x12f   : > { %v1101_v46 = vmul.f32 %v2020_v9, %v2020_v9  ;;  %v1102_v48 = vmul.f32 %v2030_v20, %v2030_v20 }
 0x130   : > { %v2062_v57 = vadd.f32 %v855_v55, %v388_v50  ;;  %965 = vst [vmem:[#allocation2 + $0x10] sm:$0xff] %v2060_v56 }
 0x131   : > { %1032 = vst [vmem:[%s1854_s16 + $0xd0] sm:$0xff] %v2060_v56 }
 0x132   : > { %950 = vst [vmem:[#allocation2 + $0xb8] sm:$0xff] %v2062_v57  ;;  %v805_v58 = vpop.f32.mrf.mxu2  ;;  %v1090_v50 = vmul.f32 %v2062_v57, %v2062_v57  ;;  %v1049_v55 = vadd.f32 %v1048_v49, %v2062_v57 }
 0x133   : > { %1017 = vst [vmem:[%s1854_s16 + $0x58] sm:$0xff] %v2062_v57  ;;  %v894_v60 = vpop.f32.mrf.mxu3 }
 0x134   : > { %v768_v61 = vpop.f32.mrf.mxu0  ;;  %v895_v3 = vadd.f32 %v894_v60, %v805_v58  ;;  %v1121_v58 = vadd.f32 %v1120_v54, %v1090_v50 }
 0x135   : > { %v857_v2 = vpop.f32.mrf.mxu1 }
 0x136   : > { %v858_v4 = vadd.f32 %v857_v2, %v768_v61  ;;  %v2070_v5 = vadd.f32 %v895_v3, %v404_v59  ;;  %v392_v3 = vld [vmem:[#allocation2 + $0x78] sm:$0xff] }
 0x138   : > { %v919_v6 = vadd.f32 %v858_v4, %v389_v1  ;;  %966 = vst [vmem:[#allocation2 + $0x28] sm:$0xff] %v2070_v5  ;;  %v407_v1 = vld [vmem:[#allocation2 + $0x20] sm:$0xff] }
 0x139   : > { %1033 = vst [vmem:[%s1854_s16 + $0xd8] sm:$0xff] %v2070_v5 }
 0x13a   : > { %951 = vst [vmem:[#allocation2 + $0x60] sm:$0xff] %v919_v6  ;;  %v808_v8 = vpop.f32.mrf.mxu2  ;;  %v1091_v32 = vmul.f32 %v919_v6, %v919_v6  ;;  %v1050_v59 = vadd.f32 %v1049_v55, %v919_v6 }
 0x13b   : > { %1018 = vst [vmem:[%s1854_s16 + $0x60] sm:$0xff] %v919_v6  ;;  %v897_v12 = vpop.f32.mrf.mxu3 }
 0x13c   : > { %v770_v14 = vpop.f32.mrf.mxu0  ;;  %v898_v17 = vadd.f32 %v897_v12, %v808_v8  ;;  %v1122_v8 = vadd.f32 %v1121_v58, %v1091_v32 }
 0x13d   : > { %v859_v16 = vpop.f32.mrf.mxu1 }
 0x13e   : > { %v860_v22 = vadd.f32 %v859_v16, %v770_v14  ;;  %v2082_v23 = vadd.f32 %v898_v17, %v405_v11 }
 0x140   : > { %v920_v28 = vadd.f32 %v860_v22, %v390_v15  ;;  %967 = vst [vmem:[#allocation2 + $0xa0] sm:$0xff] %v2082_v23  ;;  %v1095_v22 = vmul.f32 %v1971_v63, %v1971_v63 }
 0x141   : > { %1034 = vst [vmem:[%s1854_s16 + $0xe0] sm:$0xff] %v2082_v23 }
 0x142   : > { %952 = vst [vmem:[#allocation2 + $0xf0] sm:$0xff] %v920_v28  ;;  %v810_v0 = vpop.f32.mrf.mxu2  ;;  %v1092_v60 = vmul.f32 %v920_v28, %v920_v28  ;;  %v1051_v11 = vadd.f32 %v1050_v59, %v920_v28 }
 0x143   : > { %1019 = vst [vmem:[%s1854_s16 + $0x68] sm:$0xff] %v920_v28  ;;  %v899_v35 = vpop.f32.mrf.mxu3  ;;  %v408_v28 = vld [vmem:[#allocation2 + $0x98] sm:$0xff] }
 0x144   : > { %v773_v36 = vpop.f32.mrf.mxu0  ;;  %v900_v10 = vadd.f32 %v899_v35, %v810_v0  ;;  %v1123_v15 = vadd.f32 %v1122_v8, %v1092_v60  ;;  %v1097_v0 = vmul.f32 %v1983_v26, %v1983_v26  ;;  %v1098_v35 = vmul.f32 %v1989_v39, %v1989_v39 }
 0x145   : > { %v862_v38 = vpop.f32.mrf.mxu1 }
 0x146   : > { %v863_v21 = vadd.f32 %v862_v38, %v773_v36  ;;  %v2101_v47 = vadd.f32 %v900_v10, %v406_v34  ;;  %v1099_v38 = vmul.f32 %v1999_v52, %v1999_v52 }
 0x148   : > { %v921_v51 = vadd.f32 %v863_v21, %v391_v37  ;;  %968 = vst [vmem:[#allocation2 + $0xf8] sm:$0xff] %v2101_v47 }
 0x149   : > { %1035 = vst [vmem:[%s1854_s16 + $0xe8] sm:$0xff] %v2101_v47 }
 0x14a   : > { %953 = vst [vmem:[#allocation2 + $0x8] sm:$0xff] %v921_v51  ;;  %v813_v61 = vpop.f32.mrf.mxu2  ;;  %v1093_v57 = vmul.f32 %v921_v51, %v921_v51  ;;  %v1052_v16 = vadd.f32 %v1051_v11, %v921_v51 }
 0x14b   : > { %1020 = vst [vmem:[%s1854_s16 + $0x70] sm:$0xff] %v921_v51  ;;  %v902_v45 = vpop.f32.mrf.mxu3 }
 0x14c   : > { %v775_v2 = vpop.f32.mrf.mxu0  ;;  %v903_v7 = vadd.f32 %v902_v45, %v813_v61  ;;  %v1124_v17 = vadd.f32 %v1123_v15, %v1093_v57 }
 0x14d   : > { %v864_v4 = vpop.f32.mrf.mxu1 }
 0x14e   : > { %v865_v12 = vadd.f32 %v864_v4, %v775_v2  ;;  %v937_v14 = vadd.f32 %v903_v7, %v407_v1  ;;  %v1107_v1 = vmul.f32 %v2082_v23, %v2082_v23 }
 0x150   : > { %v922_v6 = vadd.f32 %v865_v12, %v392_v3  ;;  %969 = vst [vmem:[#allocation2 + $0x20] sm:$0xff] %v937_v14  ;;  %v1108_v3 = vmul.f32 %v2101_v47, %v2101_v47  ;;  %v1109_v7 = vmul.f32 %v937_v14, %v937_v14 }
 0x151   : > { %1036 = vst [vmem:[%s1854_s16 + $0xf0] sm:$0xff] %v937_v14 }
 0x152   : > { %954 = vst [vmem:[#allocation2 + $0x78] sm:$0xff] %v922_v6  ;;  %v1053_v18 = vadd.f32 %v1052_v16, %v922_v6  ;;  %v1094_v19 = vmul.f32 %v922_v6, %v922_v6  ;;  %v815_v27 = vpop.f32.mrf.mxu2 }
 0x153   : > { %1021 = vst [vmem:[%s1854_s16 + $0x78] sm:$0xff] %v922_v6  ;;  %v904_v29 = vpop.f32.mrf.mxu3 }
 0x154   : > { %v1054_v24 = vadd.f32 %v1053_v18, %v1971_v63  ;;  %v1125_v25 = vadd.f32 %v1124_v17, %v1094_v19  ;;  %v905_v41 = vadd.f32 %v904_v29, %v815_v27 }
 0x156   : > { %v1055_v30 = vadd.f32 %v1054_v24, %v1977_v13  ;;  %v1126_v33 = vadd.f32 %v1125_v25, %v1095_v22  ;;  %v938_v43 = vadd.f32 %v905_v41, %v408_v28  ;;  %v1038_v24 = vld [vmem:[#allocation3] sm:$0x1] }
 0x158   : > { %v1056_v34 = vadd.f32 %v1055_v30, %v1983_v26  ;;  %v1127_v63 = vadd.f32 %v1126_v33, %v1096_v53  ;;  %970 = vst [vmem:[#allocation2 + $0x98] sm:$0xff] %v938_v43  ;;  %v1110_v57 = vmul.f32 %v938_v43, %v938_v43 }
 0x159   : > { %1037 = vst [vmem:[%s1854_s16 + $0xf8] sm:$0xff] %v938_v43 }
 0x15a   : > { %v1057_v36 = vadd.f32 %v1056_v34, %v1989_v39  ;;  %v1128_v37 = vadd.f32 %v1127_v63, %v1097_v0 }
 0x15c   : > { %v1058_v13 = vadd.f32 %v1057_v36, %v1999_v52  ;;  %v1129_v10 = vadd.f32 %v1128_v37, %v1098_v35  ;;  %v1103_v52 = vmul.f32 %v2040_v31, %v2040_v31 }
 0x15e   : > { %v1059_v26 = vadd.f32 %v1058_v13, %v2010_v62  ;;  %v1130_v42 = vadd.f32 %v1129_v10, %v1099_v38  ;;  %v1104_v62 = vmul.f32 %v2050_v44, %v2050_v44 }
 0x160   : > { %v1131_v21 = vadd.f32 %v1130_v42, %v1100_v40  ;;  %v1060_v39 = vadd.f32 %v1059_v26, %v2020_v9  ;;  %v1105_v9 = vmul.f32 %v2060_v56, %v2060_v56 }
 0x162   : > { %v1061_v49 = vadd.f32 %v1060_v39, %v2030_v20  ;;  %v1132_v50 = vadd.f32 %v1131_v21, %v1101_v46  ;;  %v1106_v20 = vmul.f32 %v2070_v5, %v2070_v5 }
 0x164   : > { %v1062_v51 = vadd.f32 %v1061_v49, %v2040_v31  ;;  %v1133_v54 = vadd.f32 %v1132_v50, %v1102_v48 }
 0x166   : > { %v1063_v55 = vadd.f32 %v1062_v51, %v2050_v44  ;;  %v1134_v32 = vadd.f32 %v1133_v54, %v1103_v52 }
 0x168   : > { %v1064_v58 = vadd.f32 %v1063_v55, %v2060_v56  ;;  %v1135_v59 = vadd.f32 %v1134_v32, %v1104_v62 }
 0x16a   : > { %v1065_v60 = vadd.f32 %v1064_v58, %v2070_v5  ;;  %v1136_v61 = vadd.f32 %v1135_v59, %v1105_v9 }
 0x16c   : > { %v1066_v31 = vadd.f32 %v1065_v60, %v2082_v23  ;;  %v1137_v45 = vadd.f32 %v1136_v61, %v1106_v20 }
 0x16e   : > { %v1138_v44 = vadd.f32 %v1137_v45, %v1107_v1  ;;  %v1067_v2 = vadd.f32 %v1066_v31, %v2101_v47  ;;  %v1078_v47 = vld [vmem:[#allocation4] sm:$0x1] }
 0x170   : > { %v1139_v56 = vadd.f32 %v1138_v44, %v1108_v3  ;;  %v1068_v4 = vadd.f32 %v1067_v2, %v937_v14 }
 0x172   : > { %v1140_v8 = vadd.f32 %v1139_v56, %v1109_v7  ;;  %v1069_v11 = vadd.f32 %v1068_v4, %v938_v43 }
 0x174   : > { %v1070_v5 = vrot.slane %v1069_v11, 4  ;;  %v1141_v12 = vadd.f32 %v1140_v8, %v1110_v57 }
 0x176   : > { %v1071_v15 = vadd.f32 %v1070_v5, %v1069_v11  ;;  %v1142_v16 = vrot.slane %v1141_v12, 4 }
 0x178   : > { %v1072_v6 = vrot.slane %v1071_v15, 2  ;;  %v1143_v17 = vadd.f32 %v1142_v16, %v1141_v12 }
 0x17a   : > { %v1073_v23 = vadd.f32 %v1072_v6, %v1071_v15  ;;  %v1144_v18 = vrot.slane %v1143_v17, 2 }
 0x17c   : > { %v1074_v19 = vrot.slane %v1073_v23, 1  ;;  %v1145_v22 = vadd.f32 %v1144_v18, %v1143_v17 }
 0x17e   : > { %v1075_v25 = vadd.f32 %v1074_v19, %v1073_v23  ;;  %v1146_v27 = vrot.slane %v1145_v22, 1 }
 0x180   : > { %v1076_v28 = vadd.f32 %v1075_v25, %v1038_v24  ;;  %v1147_v29 = vadd.f32 %v1146_v27, %v1145_v22  ;;  %1154 = sbr.rel (!%p1150_p13) target bundleno = 397 (0x18d), region = 48 }
 0x182   : > { %1077 = vst [vmem:[#allocation3] sm:$0x1] %v1076_v28  ;;  %v1148_v14 = vadd.f32 %v1147_v29, %v1078_v47 }
 0x184   : > { %1149 = vst [vmem:[#allocation4] sm:$0x1] %v1148_v14 }
 0x189   : > { %v1155_v41 = vld [vmem:[#allocation3] sm:$0x1] }
 0x18a   : > { %1156 = vst [vmem:[%s2207_s4] sm:$0x1] %v1155_v41 }
 0x18b   : > { %v1157_v53 = vld [vmem:[#allocation4] sm:$0x1] }
 0x18c   : > { %1158 = vst [vmem:[%s2208_s5] sm:$0x1] %v1157_v53 }
 0x18d PF: > { %s1594_s14 = sshll.u32 %s1740_s21, 8  ;;  %s1179_s27 = sshll.u32 %s1854_s16, 4  ;;  %s1180_s27 = int_to_ptr.vmem [resolvable:$true] %s1179_s27 }
 0x18e   : > { %s1178_s25 = scalar_lea.hbm %s2206_s3, %s1594_s14  ;;  %s1160_s8 = scalar_lea.sflag [#allocation6], %s286_s7 }
 0x18f   : > { %s1181_s29 = sshll.u32 %s1178_s25, 4  ;;  %s1690_s21 = scalar_lea.hbm %s2206_s3, 2048  ;;  %s1182_s29 = int_to_ptr.hbm [resolvable:$true] %s1181_s29 }
 0x190   : > { %s1684_s9 = sshra.s32 %s1182_s29, 4  ;;  %s1685_s9 = int_to_ptr.hbm [resolvable:$true] %s1684_s9 }
 0x191   : > { %s1686_s10 = scalar_lea.hbm %s1685_s9, 256  ;;  %p1691_p3 = scmp.lt.s32.totalorder %s1685_s9, %s2206_s3 }
 0x192   : > { %p1687_p0 = scmp.ne.s32.totalorder %s1685_s9, %s1686_s10  ;;  %p1692_p5 = scmp.lt.s32.totalorder %s1690_s21, %s1686_s10 }
 0x194   : > { %p1688_p1 = pnand %p1687_p0, %p1823_p4  ;;  %p1693_p6 = por %p1692_p5, %p1691_p3 }
 0x196   : > { %p1689_p2 = pneg %p1688_p1 }
 0x198   : > { %p1694_p7 = pnand %p1693_p6, %p1689_p2 }
 0x19a   : > { %1697 = shalt.err (!%p1694_p7)
}
 0x19b   : > { %s1751_s7 = smov 128   ;;  %s1752_s16 = smov 8  }
 0x19c   : > { %1611 = dma.vmem_to_hbm [thread:$0]  (%p1823_p4), %s1180_s27, 4096, %s1182_s29, %s1160_s8, %s1751_s7, %s1751_s7, %s1752_s16  }
 0x19d PF: > { %p1617_p9 = scmp.ge.s32.totalorder %s1748_s23, 2  ;;  %s1214_s14 = sand.u32 1, %s1728_s18  }
 0x19e   : > { %s1215_s17 = scalar_lea.sflag [#allocation6], %s1214_s14 }
 0x19f   : > { %p1614_p10 = pnand %p1617_p9, %p1830_p8 }
 0x1a1   : > { %p1615_p11 = pneg %p1614_p10 }
 0x1a3   : > { %1723 = dma.done.wait (%p1615_p11), %s1215_s17, 4096  }
 0x1a4   : > { %1725 = vsyncadd (%p1615_p11), %s1215_s17, 4294963200  ;;  %s19_s23 = sadd.s32 1, %s1748_s23   ;;  %s2211_s18 = smov %s1732_s19 }
 0x1a5   : > { %p16_p12 = scmp.ge.s32.totalorder %s19_s23, 10   ;;  %s2212_s19 = smov %s1736_s20 }
 0x1a6   : > { %s2213_s20 = smov %s1836_s6  ;;  %s2214_s21 = smov %s1744_s22 }
 0x1a7   : > { %s2215_s22 = smov %s2217_s26  ;;  %18 = sbr.rel (!%p16_p12) target bundleno = 4 (0x4), region = 113 }
 0x1ac   :  { %1221 = vsyncpa [#allocation6], 1 }
 0x1ad   :  { %1223 = vsyncpa [#allocation6 + $0x1], 1 }

</bundles_post_ra>
